<compile_context>
chip_gen: v6e
topology: v6e:2x2x1
jax: 0.10.0
libtpu: 0.0.40
codegen_flags: <defaults>
</compile_context>

<pallas_src>
import functools

import numpy as np
import jax
import jax.numpy as jnp
from jax.experimental import pallas as pl
from jax.experimental.pallas import tpu as pltpu

IMAGENET_MEAN = np.array([0.485, 0.456, 0.406], np.float32)
IMAGENET_STD = np.array([0.229, 0.224, 0.225], np.float32)


# ---------------------------------------------------------------- kernel ----
def _fused_kernel(src0_ref, src1_ref,                     # scalar prefetch (SMEM)
                  taps_ref, a1_ref, a2_ref,               # VMEM inputs
                  w1_ref, w2_ref, b1_ref, b2_ref, uw_ref,
                  o_ref,                                  # (1, T, ty*fw)
                  x2w_scr, tile_scr,                      # VMEM scratch
                  *, ty, fw, gw, gh):
    yt = pl.program_id(1)

    # layer3 patch-conv (norm + pool folded into w2/b2) AND the separable
    # WIDTH upsample: once per image, result stays resident in VMEM scratch
    # (gh*fw, T) for all row tiles of this image.
    @pl.when(yt == 0)
    def _():
        x2p = (
            jnp.dot(a2_ref[0], w2_ref[...], preferred_element_type=jnp.float32)
            + b2_ref[...]
        )                                                  # (gh*gw, T)
        uw = uw_ref[...]                                   # (fw, gw)
        for g in range(gh):                                # static unroll
            x2w_scr[g * fw:(g + 1) * fw, :] = jnp.dot(
                uw, x2p[g * gw:(g + 1) * gw, :],
                preferred_element_type=jnp.float32)        # (fw, T)

    # layer2 patch-conv for this tile of output rows (norm + pool folded).
    x1 = (
        jnp.dot(a1_ref[0], w1_ref[...], preferred_element_type=jnp.float32)
        + b1_ref[...]
    )                                                      # (ty*fw, T)

    # Per output row: 2-tap height blend of width-upsampled layer3 rows
    # (pure VPU work, overlaps the MXU matmul above), assembled into a
    # (ty*fw, T) VMEM tile at static offsets.
    taps = taps_ref[...]                                   # (ty, 2)
    for dy in range(ty):                                   # static unroll
        y = yt * ty + dy
        o0 = pl.multiple_of(src0_ref[y], 8)
        o1 = pl.multiple_of(src1_ref[y], 8)
        r0 = x2w_scr[pl.ds(o0, fw), :]                     # (fw, T)
        r1 = x2w_scr[pl.ds(o1, fw), :]                     # (fw, T)
        up = taps[dy:dy + 1, 0:1] * r0 + taps[dy:dy + 1, 1:2] * r1
        tile_scr[dy * fw:(dy + 1) * fw, :] = x1[dy * fw:(dy + 1) * fw, :] + up

    # Single lane-dense store per tile: (T, ty*fw), ty*fw multiple of 128.
    o_ref[0] = tile_scr[...].T


# ------------------------------------------------------------------- glue ---
def _space_to_depth(x_nchw, p):
    # im2col for a stride==kernel conv.
    # TODO(synk): this patch gather could be folded into the kernel's DMA
    # (index_map / manual copies) instead of an XLA transpose pass.
    b, c, h, w = x_nchw.shape
    x = x_nchw.reshape(b, c, h // p, p, w // p, p)
    x = x.transpose(0, 2, 4, 1, 3, 5)                      # b, h', w', c, ph, pw
    return x.reshape(b, (h // p) * (w // p), c * p * p)


def _bilinear_matrix(in_size, out_size):
    """PyTorch F.interpolate(mode='bilinear', align_corners=False), 1-D."""
    w = np.zeros((out_size, in_size), np.float32)
    scale = in_size / out_size
    for o in range(out_size):
        src = max((o + 0.5) * scale - 0.5, 0.0)
        i0 = min(int(np.floor(src)), in_size - 1)
        i1 = min(i0 + 1, in_size - 1)
        lam = src - i0
        w[o, i0] += 1.0 - lam
        w[o, i1] += lam
    return w


def _bilinear_taps(in_size, out_size):
    """Same operator as _bilinear_matrix, as (idx0, idx1, wgt0, wgt1) taps."""
    i0 = np.zeros(out_size, np.int32)
    i1 = np.zeros(out_size, np.int32)
    g0 = np.zeros(out_size, np.float32)
    g1 = np.zeros(out_size, np.float32)
    scale = in_size / out_size
    for o in range(out_size):
        src = max((o + 0.5) * scale - 0.5, 0.0)
        a = min(int(np.floor(src)), in_size - 1)
        b = min(a + 1, in_size - 1)
        lam = src - a
        i0[o], i1[o] = a, b
        g0[o], g1[o] = 1.0 - lam, lam
    return i0, i1, g0, g1


def _adaptive_pool_matrix(length, target):
    """F.adaptive_avg_pool1d(length -> target) as a (length, target) matrix."""
    p = np.zeros((length, target), np.float32)
    for t in range(target):
        s = (t * length) // target
        e = -((-(t + 1) * length) // target)               # ceil
        p[s:e, t] = 1.0 / (e - s)
    return p


def _pick_row_tile(fh, fw, max_rows=1024):
    """Row-tile height: ty | fh, lane-dense (ty*fw % 128 == 0), bounded size."""
    cands = [ty for ty in range(1, fh + 1)
             if fh % ty == 0 and (ty * fw) % 128 == 0
             and (ty % 8 == 0 or ty == fh)]
    if not cands:
        return fh
    small = [ty for ty in cands if ty * fw <= max_rows]
    return max(small) if small else min(cands)


def pretrain_extractor_forward(images, params, target_dim):
    b, c, H, W = images.shape
    assert c == 3 and H % 32 == 0 and W % 32 == 0
    fh, fw = H // 4, W // 4                                # layer2 / output grid
    gh, gw = H // 8, W // 8                                # layer3 grid
    n1, n2 = fh * fw, gh * gw
    c1, c2 = params["w1"].shape[0], params["w2"].shape[0]
    k1, k2 = params["w1"].shape[1], params["w2"].shape[1]
    tdim = target_dim
    ty = _pick_row_tile(fh, fw)

    # im2col of the RAW image (normalization is folded into the weights).
    x32 = images.astype(jnp.float32)
    a1 = _space_to_depth(x32, 4)                           # (B, n1, k1)
    a2 = _space_to_depth(x32, 8)                           # (B, n2, k2)

    # ---- exact algebraic folds: imagenet norm + adaptive channel pooling ----
    inv = (1.0 / (IMAGENET_STD + 1e-11)).astype(np.float32)
    s1, m1 = np.repeat(inv, 16), np.repeat(IMAGENET_MEAN, 16)
    s2, m2 = np.repeat(inv, 64), np.repeat(IMAGENET_MEAN, 64)
    w1 = np.asarray(params["w1"], np.float32)
    b1 = np.asarray(params["b1"], np.float32)
    w2 = np.asarray(params["w2"], np.float32)
    b2 = np.asarray(params["b2"], np.float32)
    pool = _adaptive_pool_matrix(c1 + c2, tdim)
    p1, p2 = pool[:c1], pool[c1:]
    w1f = (w1.T * s1[:, None]) @ p1                        # (k1, T)
    b1f = (b1 - (m1 * s1) @ w1.T) @ p1                     # (T,)
    w2f = (w2.T * s2[:, None]) @ p2                        # (k2, T)
    b2f = (b2 - (m2 * s2) @ w2.T) @ p2                     # (T,)

    # Separable bilinear upsample (PyTorch align_corners=False).
    i0, i1, g0, g1 = _bilinear_taps(gh, fh)                # height taps
    src0 = jnp.asarray(i0 * fw, jnp.int32)                 # row offsets in x2w
    src1 = jnp.asarray(i1 * fw, jnp.int32)
    taps = jnp.asarray(np.stack([g0, g1], axis=1))         # (fh, 2)
    uw = jnp.asarray(_bilinear_matrix(gw, fw))             # (fw, gw)

    flops = 2 * b * (n1 * k1 * tdim + n2 * k2 * tdim
                     + gh * fw * gw * tdim) + 3 * b * n1 * tdim
    bytes_accessed = 4 * (a1.size + a2.size + w1f.size + w2f.size
                          + taps.size + uw.size + b * tdim * n1)

    out = pl.pallas_call(
        functools.partial(_fused_kernel, ty=ty, fw=fw, gw=gw, gh=gh),
        out_shape=jax.ShapeDtypeStruct((b, tdim, n1), jnp.float32),
        grid_spec=pltpu.PrefetchScalarGridSpec(
            num_scalar_prefetch=2,
            grid=(b, fh // ty),
            in_specs=[
                pl.BlockSpec((ty, 2), lambda bi, t, *_: (t, 0)),               # taps
                pl.BlockSpec((1, ty * fw, k1), lambda bi, t, *_: (bi, t, 0)),  # a1
                pl.BlockSpec((1, n2, k2), lambda bi, t, *_: (bi, 0, 0)),       # a2
                pl.BlockSpec((k1, tdim), lambda bi, t, *_: (0, 0)),            # w1f
                pl.BlockSpec((k2, tdim), lambda bi, t, *_: (0, 0)),            # w2f
                pl.BlockSpec((1, tdim), lambda bi, t, *_: (0, 0)),             # b1f
                pl.BlockSpec((1, tdim), lambda bi, t, *_: (0, 0)),             # b2f
                pl.BlockSpec((fw, gw), lambda bi, t, *_: (0, 0)),              # uw
            ],
            out_specs=pl.BlockSpec((1, tdim, ty * fw),
                                   lambda bi, t, *_: (bi, 0, t)),
            scratch_shapes=[
                pltpu.VMEM((gh * fw, tdim), jnp.float32),   # width-upsampled x2
                pltpu.VMEM((ty * fw, tdim), jnp.float32),   # assembled row tile
            ],
        ),
        compiler_params=pltpu.CompilerParams(
            dimension_semantics=("parallel", "arbitrary"),
            vmem_limit_bytes=32 * 1024 * 1024,
        ),
        cost_estimate=pl.CostEstimate(
            flops=flops, transcendentals=0, bytes_accessed=bytes_accessed),
    )(src0, src1,
      taps, a1, a2,
      jnp.asarray(w1f), jnp.asarray(w2f),
      jnp.asarray(b1f.reshape(1, tdim)), jnp.asarray(b2f.reshape(1, tdim)),
      uw)

    # Kernel already emits (B, target_dim, h*w) -> just reshape, no transpose.
    return out.reshape(b, tdim, fh, fw)


# -------------------------------------------------------- pure-JAX reference
def reference_forward(images, params, target_dim):
    b, _, H, W = images.shape
    mean = jnp.asarray(IMAGENET_MEAN)[None, :, None, None]
    std = jnp.asarray(IMAGENET_STD)[None, :, None, None]
    x = (images - mean) / (std + 1e-11)

    def conv(xn, wgt, bias, p):
        a = _space_to_depth(xn, p)
        return jnp.einsum("bnk,ck->bnc", a, wgt) + bias[None, None, :]

    x1 = conv(x, params["w1"], params["b1"], 4)
    x2 = conv(x, params["w2"], params["b2"], 8)
    fh, fw = H // 4, W // 4
    gh, gw = H // 8, W // 8
    u = jnp.asarray(np.kron(_bilinear_matrix(gh, fh), _bilinear_matrix(gw, fw)))
    x2_up = jnp.einsum("nm,bmc->bnc", u, x2)
    feat = jnp.concatenate([x1, x2_up], axis=-1)
    p_mat = jnp.asarray(_adaptive_pool_matrix(feat.shape[-1], target_dim))
    out = jnp.einsum("bnc,ct->bnt", feat, p_mat)
    return out.transpose(0, 2, 1).reshape(b, target_dim, fh, fw)


# ------------------------------------------------------------------- main ---
if __name__ == "__main__":
    key = jax.random.PRNGKey(0)
    k_img, k_w1, k_b1, k_w2, k_b2 = jax.random.split(key, 5)

    B, C, H, W = 2, 3, 64, 64
    C1, C2, TARGET_DIM = 16, 32, 24

    images = jax.random.uniform(k_img, (B, C, H, W), dtype=jnp.float32)
    params = {
        "w1": 0.05 * jax.random.normal(k_w1, (C1, C * 4 * 4), dtype=jnp.float32),
        "b1": 0.01 * jax.random.normal(k_b1, (C1,), dtype=jnp.float32),
        "w2": 0.05 * jax.random.normal(k_w2, (C2, C * 8 * 8), dtype=jnp.float32),
        "b2": 0.01 * jax.random.normal(k_b2, (C2,), dtype=jnp.float32),
    }

    out = pretrain_extractor_forward(images, params, TARGET_DIM)
    out = jax.block_until_ready(out)

    ref = reference_forward(images, params, TARGET_DIM)
    assert out.shape == (B, TARGET_DIM, H // 4, W // 4), out.shape
    np.testing.assert_allclose(np.asarray(out), np.asarray(ref), rtol=1e-4, atol=1e-4)

    print("KERNEL_OK")
</pallas_src>

<mosaic_0001>
module attributes {stable_mosaic.version = 11 : i64} {
  func.func @_fused_kernel(%arg0: i32, %arg1: i32, %arg2: memref<16xi32, #tpu.memory_space<smem>>, %arg3: memref<16xi32, #tpu.memory_space<smem>>, %arg4: memref<16x2xf32, #tpu.memory_space<vmem>>, %arg5: memref<1x256x48xf32, #tpu.memory_space<vmem>>, %arg6: memref<1x64x192xf32, #tpu.memory_space<vmem>>, %arg7: memref<48x24xf32, #tpu.memory_space<vmem>>, %arg8: memref<192x24xf32, #tpu.memory_space<vmem>>, %arg9: memref<1x24xf32, #tpu.memory_space<vmem>>, %arg10: memref<1x24xf32, #tpu.memory_space<vmem>>, %arg11: memref<16x8xf32, #tpu.memory_space<vmem>>, %arg12: memref<1x24x256xf32, #tpu.memory_space<vmem>>, %arg13: memref<128x24xf32, #tpu.memory_space<vmem>>, %arg14: memref<256x24xf32, #tpu.memory_space<vmem>>) attributes {dimension_semantics = [#tpu.dimension_semantics<parallel>, #tpu.dimension_semantics<arbitrary>], iteration_bounds = array<i64: 2, 1>, scalar_prefetch = 2 : i64, scratch_operands = 2 : i64, tpu.core_type = #tpu.core_type<tc>, window_params = [{transform_indices = @transform_0, window_bounds = array<i64: 16, 2>}, {transform_indices = @transform_1, window_bounds = array<i64: 1, 256, 48>}, {transform_indices = @transform_2, window_bounds = array<i64: 1, 64, 192>}, {pipeline_mode = #tpu.pipeline_mode<synchronous>, transform_indices = @transform_3, window_bounds = array<i64: 48, 24>}, {pipeline_mode = #tpu.pipeline_mode<synchronous>, transform_indices = @transform_4, window_bounds = array<i64: 192, 24>}, {pipeline_mode = #tpu.pipeline_mode<synchronous>, transform_indices = @transform_5, window_bounds = array<i64: 1, 24>}, {pipeline_mode = #tpu.pipeline_mode<synchronous>, transform_indices = @transform_6, window_bounds = array<i64: 1, 24>}, {pipeline_mode = #tpu.pipeline_mode<synchronous>, transform_indices = @transform_7, window_bounds = array<i64: 16, 8>}, {transform_indices = @transform_8, window_bounds = array<i64: 1, 24, 256>}]} {
    %c0_i32 = arith.constant 0 : i32
    %0 = arith.cmpi eq, %arg1, %c0_i32 : i32
    %1 = arith.extui %0 : i1 to i32
    %c0_i32_0 = arith.constant 0 : i32
    %2 = arith.cmpi ne, %1, %c0_i32_0 : i32
    scf.if %2 {
      %c0_79 = arith.constant 0 : index
      %c0_80 = arith.constant 0 : index
      %c0_81 = arith.constant 0 : index
      %368 = vector.load %arg6[%c0_79, %c0_80, %c0_81] : memref<1x64x192xf32, #tpu.memory_space<vmem>>, vector<1x64x192xf32>
      %369 = vector.shape_cast %368 : vector<1x64x192xf32> to vector<64x192xf32>
      %c0_82 = arith.constant 0 : index
      %c0_83 = arith.constant 0 : index
      %370 = vector.load %arg8[%c0_82, %c0_83] : memref<192x24xf32, #tpu.memory_space<vmem>>, vector<192x24xf32>
      %cst_84 = arith.constant dense<0.000000e+00> : vector<64x24xf32>
      %371 = tpu.matmul %369, %370, %cst_84 {dimension_numbers = #tpu.dot_dimension_numbers<[1], [0], [0], [1], [0, 0, 1, 1], [], []>} : vector<64x192xf32>, vector<192x24xf32>, vector<64x24xf32> -> vector<64x24xf32>
      %c0_85 = arith.constant 0 : index
      %c0_86 = arith.constant 0 : index
      %372 = vector.load %arg10[%c0_85, %c0_86] : memref<1x24xf32, #tpu.memory_space<vmem>>, vector<1x24xf32>
      %373 = vector.broadcast %372 : vector<1x24xf32> to vector<64x24xf32>
      %374 = arith.addf %371, %373 : vector<64x24xf32>
      %c0_87 = arith.constant 0 : index
      %c0_88 = arith.constant 0 : index
      %375 = vector.load %arg11[%c0_87, %c0_88] : memref<16x8xf32, #tpu.memory_space<vmem>>, vector<16x8xf32>
      %376 = vector.extract_strided_slice %374 {offsets = [0, 0], sizes = [8, 24], strides = [1, 1]} : vector<64x24xf32> to vector<8x24xf32>
      %cst_89 = arith.constant dense<0.000000e+00> : vector<16x24xf32>
      %377 = tpu.matmul %375, %376, %cst_89 {dimension_numbers = #tpu.dot_dimension_numbers<[1], [0], [0], [1], [0, 0, 1, 1], [], []>} : vector<16x8xf32>, vector<8x24xf32>, vector<16x24xf32> -> vector<16x24xf32>
      %c0_90 = arith.constant 0 : index
      %c0_91 = arith.constant 0 : index
      %378 = vector.load %arg13[%c0_90, %c0_91] : memref<128x24xf32, #tpu.memory_space<vmem>>, vector<16x24xf32>
      tpu.vector_store %arg13[%c0_90, %c0_91], %377 {strides = array<i32>} : memref<128x24xf32, #tpu.memory_space<vmem>>, vector<16x24xf32>,
      %379 = vector.extract_strided_slice %374 {offsets = [8, 0], sizes = [8, 24], strides = [1, 1]} : vector<64x24xf32> to vector<8x24xf32>
      %cst_92 = arith.constant dense<0.000000e+00> : vector<16x24xf32>
      %380 = tpu.matmul %375, %379, %cst_92 {dimension_numbers = #tpu.dot_dimension_numbers<[1], [0], [0], [1], [0, 0, 1, 1], [], []>} : vector<16x8xf32>, vector<8x24xf32>, vector<16x24xf32> -> vector<16x24xf32>
      %c16_93 = arith.constant 16 : index
      %c0_94 = arith.constant 0 : index
      %381 = vector.load %arg13[%c16_93, %c0_94] : memref<128x24xf32, #tpu.memory_space<vmem>>, vector<16x24xf32>
      tpu.vector_store %arg13[%c16_93, %c0_94], %380 {strides = array<i32>} : memref<128x24xf32, #tpu.memory_space<vmem>>, vector<16x24xf32>,
      %382 = vector.extract_strided_slice %374 {offsets = [16, 0], sizes = [8, 24], strides = [1, 1]} : vector<64x24xf32> to vector<8x24xf32>
      %cst_95 = arith.constant dense<0.000000e+00> : vector<16x24xf32>
      %383 = tpu.matmul %375, %382, %cst_95 {dimension_numbers = #tpu.dot_dimension_numbers<[1], [0], [0], [1], [0, 0, 1, 1], [], []>} : vector<16x8xf32>, vector<8x24xf32>, vector<16x24xf32> -> vector<16x24xf32>
      %c32_96 = arith.constant 32 : index
      %c0_97 = arith.constant 0 : index
      %384 = vector.load %arg13[%c32_96, %c0_97] : memref<128x24xf32, #tpu.memory_space<vmem>>, vector<16x24xf32>
      tpu.vector_store %arg13[%c32_96, %c0_97], %383 {strides = array<i32>} : memref<128x24xf32, #tpu.memory_space<vmem>>, vector<16x24xf32>,
      %385 = vector.extract_strided_slice %374 {offsets = [24, 0], sizes = [8, 24], strides = [1, 1]} : vector<64x24xf32> to vector<8x24xf32>
      %cst_98 = arith.constant dense<0.000000e+00> : vector<16x24xf32>
      %386 = tpu.matmul %375, %385, %cst_98 {dimension_numbers = #tpu.dot_dimension_numbers<[1], [0], [0], [1], [0, 0, 1, 1], [], []>} : vector<16x8xf32>, vector<8x24xf32>, vector<16x24xf32> -> vector<16x24xf32>
      %c48_99 = arith.constant 48 : index
      %c0_100 = arith.constant 0 : index
      %387 = vector.load %arg13[%c48_99, %c0_100] : memref<128x24xf32, #tpu.memory_space<vmem>>, vector<16x24xf32>
      tpu.vector_store %arg13[%c48_99, %c0_100], %386 {strides = array<i32>} : memref<128x24xf32, #tpu.memory_space<vmem>>, vector<16x24xf32>,
      %388 = vector.extract_strided_slice %374 {offsets = [32, 0], sizes = [8, 24], strides = [1, 1]} : vector<64x24xf32> to vector<8x24xf32>
      %cst_101 = arith.constant dense<0.000000e+00> : vector<16x24xf32>
      %389 = tpu.matmul %375, %388, %cst_101 {dimension_numbers = #tpu.dot_dimension_numbers<[1], [0], [0], [1], [0, 0, 1, 1], [], []>} : vector<16x8xf32>, vector<8x24xf32>, vector<16x24xf32> -> vector<16x24xf32>
      %c64_102 = arith.constant 64 : index
      %c0_103 = arith.constant 0 : index
      %390 = vector.load %arg13[%c64_102, %c0_103] : memref<128x24xf32, #tpu.memory_space<vmem>>, vector<16x24xf32>
      tpu.vector_store %arg13[%c64_102, %c0_103], %389 {strides = array<i32>} : memref<128x24xf32, #tpu.memory_space<vmem>>, vector<16x24xf32>,
      %391 = vector.extract_strided_slice %374 {offsets = [40, 0], sizes = [8, 24], strides = [1, 1]} : vector<64x24xf32> to vector<8x24xf32>
      %cst_104 = arith.constant dense<0.000000e+00> : vector<16x24xf32>
      %392 = tpu.matmul %375, %391, %cst_104 {dimension_numbers = #tpu.dot_dimension_numbers<[1], [0], [0], [1], [0, 0, 1, 1], [], []>} : vector<16x8xf32>, vector<8x24xf32>, vector<16x24xf32> -> vector<16x24xf32>
      %c80_105 = arith.constant 80 : index
      %c0_106 = arith.constant 0 : index
      %393 = vector.load %arg13[%c80_105, %c0_106] : memref<128x24xf32, #tpu.memory_space<vmem>>, vector<16x24xf32>
      tpu.vector_store %arg13[%c80_105, %c0_106], %392 {strides = array<i32>} : memref<128x24xf32, #tpu.memory_space<vmem>>, vector<16x24xf32>,
      %394 = vector.extract_strided_slice %374 {offsets = [48, 0], sizes = [8, 24], strides = [1, 1]} : vector<64x24xf32> to vector<8x24xf32>
      %cst_107 = arith.constant dense<0.000000e+00> : vector<16x24xf32>
      %395 = tpu.matmul %375, %394, %cst_107 {dimension_numbers = #tpu.dot_dimension_numbers<[1], [0], [0], [1], [0, 0, 1, 1], [], []>} : vector<16x8xf32>, vector<8x24xf32>, vector<16x24xf32> -> vector<16x24xf32>
      %c96_108 = arith.constant 96 : index
      %c0_109 = arith.constant 0 : index
      %396 = vector.load %arg13[%c96_108, %c0_109] : memref<128x24xf32, #tpu.memory_space<vmem>>, vector<16x24xf32>
      tpu.vector_store %arg13[%c96_108, %c0_109], %395 {strides = array<i32>} : memref<128x24xf32, #tpu.memory_space<vmem>>, vector<16x24xf32>,
      %397 = vector.extract_strided_slice %374 {offsets = [56, 0], sizes = [8, 24], strides = [1, 1]} : vector<64x24xf32> to vector<8x24xf32>
      %cst_110 = arith.constant dense<0.000000e+00> : vector<16x24xf32>
      %398 = tpu.matmul %375, %397, %cst_110 {dimension_numbers = #tpu.dot_dimension_numbers<[1], [0], [0], [1], [0, 0, 1, 1], [], []>} : vector<16x8xf32>, vector<8x24xf32>, vector<16x24xf32> -> vector<16x24xf32>
      %c112_111 = arith.constant 112 : index
      %c0_112 = arith.constant 0 : index
      %399 = vector.load %arg13[%c112_111, %c0_112] : memref<128x24xf32, #tpu.memory_space<vmem>>, vector<16x24xf32>
      tpu.vector_store %arg13[%c112_111, %c0_112], %398 {strides = array<i32>} : memref<128x24xf32, #tpu.memory_space<vmem>>, vector<16x24xf32>,
    } else {
    }
    %c0 = arith.constant 0 : index
    %c0_1 = arith.constant 0 : index
    %c0_2 = arith.constant 0 : index
    %3 = vector.load %arg5[%c0, %c0_1, %c0_2] : memref<1x256x48xf32, #tpu.memory_space<vmem>>, vector<1x256x48xf32>
    %4 = vector.shape_cast %3 : vector<1x256x48xf32> to vector<256x48xf32>
    %c0_3 = arith.constant 0 : index
    %c0_4 = arith.constant 0 : index
    %5 = vector.load %arg7[%c0_3, %c0_4] : memref<48x24xf32, #tpu.memory_space<vmem>>, vector<48x24xf32>
    %cst = arith.constant dense<0.000000e+00> : vector<256x24xf32>
    %6 = tpu.matmul %4, %5, %cst {dimension_numbers = #tpu.dot_dimension_numbers<[1], [0], [0], [1], [0, 0, 1, 1], [], []>} : vector<256x48xf32>, vector<48x24xf32>, vector<256x24xf32> -> vector<256x24xf32>
    %c0_5 = arith.constant 0 : index
    %c0_6 = arith.constant 0 : index
    %7 = vector.load %arg9[%c0_5, %c0_6] : memref<1x24xf32, #tpu.memory_space<vmem>>, vector<1x24xf32>
    %8 = vector.broadcast %7 : vector<1x24xf32> to vector<256x24xf32>
    %9 = arith.addf %6, %8 : vector<256x24xf32>
    %c0_7 = arith.constant 0 : index
    %c0_8 = arith.constant 0 : index
    %10 = vector.load %arg4[%c0_7, %c0_8] : memref<16x2xf32, #tpu.memory_space<vmem>>, vector<16x2xf32>
    %c16_i32 = arith.constant 16 : i32
    %11 = arith.muli %arg1, %c16_i32 : i32
    %c0_i32_9 = arith.constant 0 : i32
    %12 = arith.addi %11, %c0_i32_9 : i32
    %13 = arith.index_cast %12 : i32 to index
    %14 = memref.load %arg2[%13] : memref<16xi32, #tpu.memory_space<smem>>
    %15 = tpu.assume_multiple %14, 8 : i32
    %16 = arith.index_cast %12 : i32 to index
    %17 = memref.load %arg3[%16] : memref<16xi32, #tpu.memory_space<smem>>
    %18 = tpu.assume_multiple %17, 8 : i32
    %19 = arith.index_cast %15 : i32 to index
    %c0_10 = arith.constant 0 : index
    %20 = vector.load %arg13[%19, %c0_10] : memref<128x24xf32, #tpu.memory_space<vmem>>, vector<16x24xf32>
    %21 = arith.index_cast %18 : i32 to index
    %c0_11 = arith.constant 0 : index
    %22 = vector.load %arg13[%21, %c0_11] : memref<128x24xf32, #tpu.memory_space<vmem>>, vector<16x24xf32>
    %23 = vector.extract_strided_slice %10 {offsets = [0, 0], sizes = [1, 1], strides = [1, 1]} : vector<16x2xf32> to vector<1x1xf32>
    %24 = vector.broadcast %23 : vector<1x1xf32> to vector<16x24xf32>
    %25 = arith.mulf %24, %20 : vector<16x24xf32>
    %26 = vector.extract_strided_slice %10 {offsets = [0, 1], sizes = [1, 1], strides = [1, 1]} : vector<16x2xf32> to vector<1x1xf32>
    %27 = vector.broadcast %26 : vector<1x1xf32> to vector<16x24xf32>
    %28 = arith.mulf %27, %22 : vector<16x24xf32>
    %29 = arith.addf %25, %28 : vector<16x24xf32>
    %30 = vector.extract_strided_slice %9 {offsets = [0, 0], sizes = [16, 24], strides = [1, 1]} : vector<256x24xf32> to vector<16x24xf32>
    %31 = arith.addf %30, %29 : vector<16x24xf32>
    %c0_12 = arith.constant 0 : index
    %c0_13 = arith.constant 0 : index
    %32 = vector.load %arg14[%c0_12, %c0_13] : memref<256x24xf32, #tpu.memory_space<vmem>>, vector<16x24xf32>
    tpu.vector_store %arg14[%c0_12, %c0_13], %31 {strides = array<i32>} : memref<256x24xf32, #tpu.memory_space<vmem>>, vector<16x24xf32>,
    %c16_i32_14 = arith.constant 16 : i32
    %33 = arith.muli %arg1, %c16_i32_14 : i32
    %c1_i32 = arith.constant 1 : i32
    %34 = arith.addi %33, %c1_i32 : i32
    %35 = arith.index_cast %34 : i32 to index
    %36 = memref.load %arg2[%35] : memref<16xi32, #tpu.memory_space<smem>>
    %37 = tpu.assume_multiple %36, 8 : i32
    %38 = arith.index_cast %34 : i32 to index
    %39 = memref.load %arg3[%38] : memref<16xi32, #tpu.memory_space<smem>>
    %40 = tpu.assume_multiple %39, 8 : i32
    %41 = arith.index_cast %37 : i32 to index
    %c0_15 = arith.constant 0 : index
    %42 = vector.load %arg13[%41, %c0_15] : memref<128x24xf32, #tpu.memory_space<vmem>>, vector<16x24xf32>
    %43 = arith.index_cast %40 : i32 to index
    %c0_16 = arith.constant 0 : index
    %44 = vector.load %arg13[%43, %c0_16] : memref<128x24xf32, #tpu.memory_space<vmem>>, vector<16x24xf32>
    %45 = vector.extract_strided_slice %10 {offsets = [1, 0], sizes = [1, 1], strides = [1, 1]} : vector<16x2xf32> to vector<1x1xf32>
    %46 = vector.broadcast %45 : vector<1x1xf32> to vector<16x24xf32>
    %47 = arith.mulf %46, %42 : vector<16x24xf32>
    %48 = vector.extract_strided_slice %10 {offsets = [1, 1], sizes = [1, 1], strides = [1, 1]} : vector<16x2xf32> to vector<1x1xf32>
    %49 = vector.broadcast %48 : vector<1x1xf32> to vector<16x24xf32>
    %50 = arith.mulf %49, %44 : vector<16x24xf32>
    %51 = arith.addf %47, %50 : vector<16x24xf32>
    %52 = vector.extract_strided_slice %9 {offsets = [16, 0], sizes = [16, 24], strides = [1, 1]} : vector<256x24xf32> to vector<16x24xf32>
    %53 = arith.addf %52, %51 : vector<16x24xf32>
    %c16 = arith.constant 16 : index
    %c0_17 = arith.constant 0 : index
    %54 = vector.load %arg14[%c16, %c0_17] : memref<256x24xf32, #tpu.memory_space<vmem>>, vector<16x24xf32>
    tpu.vector_store %arg14[%c16, %c0_17], %53 {strides = array<i32>} : memref<256x24xf32, #tpu.memory_space<vmem>>, vector<16x24xf32>,
    %c16_i32_18 = arith.constant 16 : i32
    %55 = arith.muli %arg1, %c16_i32_18 : i32
    %c2_i32 = arith.constant 2 : i32
    %56 = arith.addi %55, %c2_i32 : i32
    %57 = arith.index_cast %56 : i32 to index
    %58 = memref.load %arg2[%57] : memref<16xi32, #tpu.memory_space<smem>>
    %59 = tpu.assume_multiple %58, 8 : i32
    %60 = arith.index_cast %56 : i32 to index
    %61 = memref.load %arg3[%60] : memref<16xi32, #tpu.memory_space<smem>>
    %62 = tpu.assume_multiple %61, 8 : i32
    %63 = arith.index_cast %59 : i32 to index
    %c0_19 = arith.constant 0 : index
    %64 = vector.load %arg13[%63, %c0_19] : memref<128x24xf32, #tpu.memory_space<vmem>>, vector<16x24xf32>
    %65 = arith.index_cast %62 : i32 to index
    %c0_20 = arith.constant 0 : index
    %66 = vector.load %arg13[%65, %c0_20] : memref<128x24xf32, #tpu.memory_space<vmem>>, vector<16x24xf32>
    %67 = vector.extract_strided_slice %10 {offsets = [2, 0], sizes = [1, 1], strides = [1, 1]} : vector<16x2xf32> to vector<1x1xf32>
    %68 = vector.broadcast %67 : vector<1x1xf32> to vector<16x24xf32>
    %69 = arith.mulf %68, %64 : vector<16x24xf32>
    %70 = vector.extract_strided_slice %10 {offsets = [2, 1], sizes = [1, 1], strides = [1, 1]} : vector<16x2xf32> to vector<1x1xf32>
    %71 = vector.broadcast %70 : vector<1x1xf32> to vector<16x24xf32>
    %72 = arith.mulf %71, %66 : vector<16x24xf32>
    %73 = arith.addf %69, %72 : vector<16x24xf32>
    %74 = vector.extract_strided_slice %9 {offsets = [32, 0], sizes = [16, 24], strides = [1, 1]} : vector<256x24xf32> to vector<16x24xf32>
    %75 = arith.addf %74, %73 : vector<16x24xf32>
    %c32 = arith.constant 32 : index
    %c0_21 = arith.constant 0 : index
    %76 = vector.load %arg14[%c32, %c0_21] : memref<256x24xf32, #tpu.memory_space<vmem>>, vector<16x24xf32>
    tpu.vector_store %arg14[%c32, %c0_21], %75 {strides = array<i32>} : memref<256x24xf32, #tpu.memory_space<vmem>>, vector<16x24xf32>,
    %c16_i32_22 = arith.constant 16 : i32
    %77 = arith.muli %arg1, %c16_i32_22 : i32
    %c3_i32 = arith.constant 3 : i32
    %78 = arith.addi %77, %c3_i32 : i32
    %79 = arith.index_cast %78 : i32 to index
    %80 = memref.load %arg2[%79] : memref<16xi32, #tpu.memory_space<smem>>
    %81 = tpu.assume_multiple %80, 8 : i32
    %82 = arith.index_cast %78 : i32 to index
    %83 = memref.load %arg3[%82] : memref<16xi32, #tpu.memory_space<smem>>
    %84 = tpu.assume_multiple %83, 8 : i32
    %85 = arith.index_cast %81 : i32 to index
    %c0_23 = arith.constant 0 : index
    %86 = vector.load %arg13[%85, %c0_23] : memref<128x24xf32, #tpu.memory_space<vmem>>, vector<16x24xf32>
    %87 = arith.index_cast %84 : i32 to index
    %c0_24 = arith.constant 0 : index
    %88 = vector.load %arg13[%87, %c0_24] : memref<128x24xf32, #tpu.memory_space<vmem>>, vector<16x24xf32>
    %89 = vector.extract_strided_slice %10 {offsets = [3, 0], sizes = [1, 1], strides = [1, 1]} : vector<16x2xf32> to vector<1x1xf32>
    %90 = vector.broadcast %89 : vector<1x1xf32> to vector<16x24xf32>
    %91 = arith.mulf %90, %86 : vector<16x24xf32>
    %92 = vector.extract_strided_slice %10 {offsets = [3, 1], sizes = [1, 1], strides = [1, 1]} : vector<16x2xf32> to vector<1x1xf32>
    %93 = vector.broadcast %92 : vector<1x1xf32> to vector<16x24xf32>
    %94 = arith.mulf %93, %88 : vector<16x24xf32>
    %95 = arith.addf %91, %94 : vector<16x24xf32>
    %96 = vector.extract_strided_slice %9 {offsets = [48, 0], sizes = [16, 24], strides = [1, 1]} : vector<256x24xf32> to vector<16x24xf32>
    %97 = arith.addf %96, %95 : vector<16x24xf32>
    %c48 = arith.constant 48 : index
    %c0_25 = arith.constant 0 : index
    %98 = vector.load %arg14[%c48, %c0_25] : memref<256x24xf32, #tpu.memory_space<vmem>>, vector<16x24xf32>
    tpu.vector_store %arg14[%c48, %c0_25], %97 {strides = array<i32>} : memref<256x24xf32, #tpu.memory_space<vmem>>, vector<16x24xf32>,
    %c16_i32_26 = arith.constant 16 : i32
    %99 = arith.muli %arg1, %c16_i32_26 : i32
    %c4_i32 = arith.constant 4 : i32
    %100 = arith.addi %99, %c4_i32 : i32
    %101 = arith.index_cast %100 : i32 to index
    %102 = memref.load %arg2[%101] : memref<16xi32, #tpu.memory_space<smem>>
    %103 = tpu.assume_multiple %102, 8 : i32
    %104 = arith.index_cast %100 : i32 to index
    %105 = memref.load %arg3[%104] : memref<16xi32, #tpu.memory_space<smem>>
    %106 = tpu.assume_multiple %105, 8 : i32
    %107 = arith.index_cast %103 : i32 to index
    %c0_27 = arith.constant 0 : index
    %108 = vector.load %arg13[%107, %c0_27] : memref<128x24xf32, #tpu.memory_space<vmem>>, vector<16x24xf32>
    %109 = arith.index_cast %106 : i32 to index
    %c0_28 = arith.constant 0 : index
    %110 = vector.load %arg13[%109, %c0_28] : memref<128x24xf32, #tpu.memory_space<vmem>>, vector<16x24xf32>
    %111 = vector.extract_strided_slice %10 {offsets = [4, 0], sizes = [1, 1], strides = [1, 1]} : vector<16x2xf32> to vector<1x1xf32>
    %112 = vector.broadcast %111 : vector<1x1xf32> to vector<16x24xf32>
    %113 = arith.mulf %112, %108 : vector<16x24xf32>
    %114 = vector.extract_strided_slice %10 {offsets = [4, 1], sizes = [1, 1], strides = [1, 1]} : vector<16x2xf32> to vector<1x1xf32>
    %115 = vector.broadcast %114 : vector<1x1xf32> to vector<16x24xf32>
    %116 = arith.mulf %115, %110 : vector<16x24xf32>
    %117 = arith.addf %113, %116 : vector<16x24xf32>
    %118 = vector.extract_strided_slice %9 {offsets = [64, 0], sizes = [16, 24], strides = [1, 1]} : vector<256x24xf32> to vector<16x24xf32>
    %119 = arith.addf %118, %117 : vector<16x24xf32>
    %c64 = arith.constant 64 : index
    %c0_29 = arith.constant 0 : index
    %120 = vector.load %arg14[%c64, %c0_29] : memref<256x24xf32, #tpu.memory_space<vmem>>, vector<16x24xf32>
    tpu.vector_store %arg14[%c64, %c0_29], %119 {strides = array<i32>} : memref<256x24xf32, #tpu.memory_space<vmem>>, vector<16x24xf32>,
    %c16_i32_30 = arith.constant 16 : i32
    %121 = arith.muli %arg1, %c16_i32_30 : i32
    %c5_i32 = arith.constant 5 : i32
    %122 = arith.addi %121, %c5_i32 : i32
    %123 = arith.index_cast %122 : i32 to index
    %124 = memref.load %arg2[%123] : memref<16xi32, #tpu.memory_space<smem>>
    %125 = tpu.assume_multiple %124, 8 : i32
    %126 = arith.index_cast %122 : i32 to index
    %127 = memref.load %arg3[%126] : memref<16xi32, #tpu.memory_space<smem>>
    %128 = tpu.assume_multiple %127, 8 : i32
    %129 = arith.index_cast %125 : i32 to index
    %c0_31 = arith.constant 0 : index
    %130 = vector.load %arg13[%129, %c0_31] : memref<128x24xf32, #tpu.memory_space<vmem>>, vector<16x24xf32>
    %131 = arith.index_cast %128 : i32 to index
    %c0_32 = arith.constant 0 : index
    %132 = vector.load %arg13[%131, %c0_32] : memref<128x24xf32, #tpu.memory_space<vmem>>, vector<16x24xf32>
    %133 = vector.extract_strided_slice %10 {offsets = [5, 0], sizes = [1, 1], strides = [1, 1]} : vector<16x2xf32> to vector<1x1xf32>
    %134 = vector.broadcast %133 : vector<1x1xf32> to vector<16x24xf32>
    %135 = arith.mulf %134, %130 : vector<16x24xf32>
    %136 = vector.extract_strided_slice %10 {offsets = [5, 1], sizes = [1, 1], strides = [1, 1]} : vector<16x2xf32> to vector<1x1xf32>
    %137 = vector.broadcast %136 : vector<1x1xf32> to vector<16x24xf32>
    %138 = arith.mulf %137, %132 : vector<16x24xf32>
    %139 = arith.addf %135, %138 : vector<16x24xf32>
    %140 = vector.extract_strided_slice %9 {offsets = [80, 0], sizes = [16, 24], strides = [1, 1]} : vector<256x24xf32> to vector<16x24xf32>
    %141 = arith.addf %140, %139 : vector<16x24xf32>
    %c80 = arith.constant 80 : index
    %c0_33 = arith.constant 0 : index
    %142 = vector.load %arg14[%c80, %c0_33] : memref<256x24xf32, #tpu.memory_space<vmem>>, vector<16x24xf32>
    tpu.vector_store %arg14[%c80, %c0_33], %141 {strides = array<i32>} : memref<256x24xf32, #tpu.memory_space<vmem>>, vector<16x24xf32>,
    %c16_i32_34 = arith.constant 16 : i32
    %143 = arith.muli %arg1, %c16_i32_34 : i32
    %c6_i32 = arith.constant 6 : i32
    %144 = arith.addi %143, %c6_i32 : i32
    %145 = arith.index_cast %144 : i32 to index
    %146 = memref.load %arg2[%145] : memref<16xi32, #tpu.memory_space<smem>>
    %147 = tpu.assume_multiple %146, 8 : i32
    %148 = arith.index_cast %144 : i32 to index
    %149 = memref.load %arg3[%148] : memref<16xi32, #tpu.memory_space<smem>>
    %150 = tpu.assume_multiple %149, 8 : i32
    %151 = arith.index_cast %147 : i32 to index
    %c0_35 = arith.constant 0 : index
    %152 = vector.load %arg13[%151, %c0_35] : memref<128x24xf32, #tpu.memory_space<vmem>>, vector<16x24xf32>
    %153 = arith.index_cast %150 : i32 to index
    %c0_36 = arith.constant 0 : index
    %154 = vector.load %arg13[%153, %c0_36] : memref<128x24xf32, #tpu.memory_space<vmem>>, vector<16x24xf32>
    %155 = vector.extract_strided_slice %10 {offsets = [6, 0], sizes = [1, 1], strides = [1, 1]} : vector<16x2xf32> to vector<1x1xf32>
    %156 = vector.broadcast %155 : vector<1x1xf32> to vector<16x24xf32>
    %157 = arith.mulf %156, %152 : vector<16x24xf32>
    %158 = vector.extract_strided_slice %10 {offsets = [6, 1], sizes = [1, 1], strides = [1, 1]} : vector<16x2xf32> to vector<1x1xf32>
    %159 = vector.broadcast %158 : vector<1x1xf32> to vector<16x24xf32>
    %160 = arith.mulf %159, %154 : vector<16x24xf32>
    %161 = arith.addf %157, %160 : vector<16x24xf32>
    %162 = vector.extract_strided_slice %9 {offsets = [96, 0], sizes = [16, 24], strides = [1, 1]} : vector<256x24xf32> to vector<16x24xf32>
    %163 = arith.addf %162, %161 : vector<16x24xf32>
    %c96 = arith.constant 96 : index
    %c0_37 = arith.constant 0 : index
    %164 = vector.load %arg14[%c96, %c0_37] : memref<256x24xf32, #tpu.memory_space<vmem>>, vector<16x24xf32>
    tpu.vector_store %arg14[%c96, %c0_37], %163 {strides = array<i32>} : memref<256x24xf32, #tpu.memory_space<vmem>>, vector<16x24xf32>,
    %c16_i32_38 = arith.constant 16 : i32
    %165 = arith.muli %arg1, %c16_i32_38 : i32
    %c7_i32 = arith.constant 7 : i32
    %166 = arith.addi %165, %c7_i32 : i32
    %167 = arith.index_cast %166 : i32 to index
    %168 = memref.load %arg2[%167] : memref<16xi32, #tpu.memory_space<smem>>
    %169 = tpu.assume_multiple %168, 8 : i32
    %170 = arith.index_cast %166 : i32 to index
    %171 = memref.load %arg3[%170] : memref<16xi32, #tpu.memory_space<smem>>
    %172 = tpu.assume_multiple %171, 8 : i32
    %173 = arith.index_cast %169 : i32 to index
    %c0_39 = arith.constant 0 : index
    %174 = vector.load %arg13[%173, %c0_39] : memref<128x24xf32, #tpu.memory_space<vmem>>, vector<16x24xf32>
    %175 = arith.index_cast %172 : i32 to index
    %c0_40 = arith.constant 0 : index
    %176 = vector.load %arg13[%175, %c0_40] : memref<128x24xf32, #tpu.memory_space<vmem>>, vector<16x24xf32>
    %177 = vector.extract_strided_slice %10 {offsets = [7, 0], sizes = [1, 1], strides = [1, 1]} : vector<16x2xf32> to vector<1x1xf32>
    %178 = vector.broadcast %177 : vector<1x1xf32> to vector<16x24xf32>
    %179 = arith.mulf %178, %174 : vector<16x24xf32>
    %180 = vector.extract_strided_slice %10 {offsets = [7, 1], sizes = [1, 1], strides = [1, 1]} : vector<16x2xf32> to vector<1x1xf32>
    %181 = vector.broadcast %180 : vector<1x1xf32> to vector<16x24xf32>
    %182 = arith.mulf %181, %176 : vector<16x24xf32>
    %183 = arith.addf %179, %182 : vector<16x24xf32>
    %184 = vector.extract_strided_slice %9 {offsets = [112, 0], sizes = [16, 24], strides = [1, 1]} : vector<256x24xf32> to vector<16x24xf32>
    %185 = arith.addf %184, %183 : vector<16x24xf32>
    %c112 = arith.constant 112 : index
    %c0_41 = arith.constant 0 : index
    %186 = vector.load %arg14[%c112, %c0_41] : memref<256x24xf32, #tpu.memory_space<vmem>>, vector<16x24xf32>
    tpu.vector_store %arg14[%c112, %c0_41], %185 {strides = array<i32>} : memref<256x24xf32, #tpu.memory_space<vmem>>, vector<16x24xf32>,
    %c16_i32_42 = arith.constant 16 : i32
    %187 = arith.muli %arg1, %c16_i32_42 : i32
    %c8_i32 = arith.constant 8 : i32
    %188 = arith.addi %187, %c8_i32 : i32
    %189 = arith.index_cast %188 : i32 to index
    %190 = memref.load %arg2[%189] : memref<16xi32, #tpu.memory_space<smem>>
    %191 = tpu.assume_multiple %190, 8 : i32
    %192 = arith.index_cast %188 : i32 to index
    %193 = memref.load %arg3[%192] : memref<16xi32, #tpu.memory_space<smem>>
    %194 = tpu.assume_multiple %193, 8 : i32
    %195 = arith.index_cast %191 : i32 to index
    %c0_43 = arith.constant 0 : index
    %196 = vector.load %arg13[%195, %c0_43] : memref<128x24xf32, #tpu.memory_space<vmem>>, vector<16x24xf32>
    %197 = arith.index_cast %194 : i32 to index
    %c0_44 = arith.constant 0 : index
    %198 = vector.load %arg13[%197, %c0_44] : memref<128x24xf32, #tpu.memory_space<vmem>>, vector<16x24xf32>
    %199 = vector.extract_strided_slice %10 {offsets = [8, 0], sizes = [1, 1], strides = [1, 1]} : vector<16x2xf32> to vector<1x1xf32>
    %200 = vector.broadcast %199 : vector<1x1xf32> to vector<16x24xf32>
    %201 = arith.mulf %200, %196 : vector<16x24xf32>
    %202 = vector.extract_strided_slice %10 {offsets = [8, 1], sizes = [1, 1], strides = [1, 1]} : vector<16x2xf32> to vector<1x1xf32>
    %203 = vector.broadcast %202 : vector<1x1xf32> to vector<16x24xf32>
    %204 = arith.mulf %203, %198 : vector<16x24xf32>
    %205 = arith.addf %201, %204 : vector<16x24xf32>
    %206 = vector.extract_strided_slice %9 {offsets = [128, 0], sizes = [16, 24], strides = [1, 1]} : vector<256x24xf32> to vector<16x24xf32>
    %207 = arith.addf %206, %205 : vector<16x24xf32>
    %c128 = arith.constant 128 : index
    %c0_45 = arith.constant 0 : index
    %208 = vector.load %arg14[%c128, %c0_45] : memref<256x24xf32, #tpu.memory_space<vmem>>, vector<16x24xf32>
    tpu.vector_store %arg14[%c128, %c0_45], %207 {strides = array<i32>} : memref<256x24xf32, #tpu.memory_space<vmem>>, vector<16x24xf32>,
    %c16_i32_46 = arith.constant 16 : i32
    %209 = arith.muli %arg1, %c16_i32_46 : i32
    %c9_i32 = arith.constant 9 : i32
    %210 = arith.addi %209, %c9_i32 : i32
    %211 = arith.index_cast %210 : i32 to index
    %212 = memref.load %arg2[%211] : memref<16xi32, #tpu.memory_space<smem>>
    %213 = tpu.assume_multiple %212, 8 : i32
    %214 = arith.index_cast %210 : i32 to index
    %215 = memref.load %arg3[%214] : memref<16xi32, #tpu.memory_space<smem>>
    %216 = tpu.assume_multiple %215, 8 : i32
    %217 = arith.index_cast %213 : i32 to index
    %c0_47 = arith.constant 0 : index
    %218 = vector.load %arg13[%217, %c0_47] : memref<128x24xf32, #tpu.memory_space<vmem>>, vector<16x24xf32>
    %219 = arith.index_cast %216 : i32 to index
    %c0_48 = arith.constant 0 : index
    %220 = vector.load %arg13[%219, %c0_48] : memref<128x24xf32, #tpu.memory_space<vmem>>, vector<16x24xf32>
    %221 = vector.extract_strided_slice %10 {offsets = [9, 0], sizes = [1, 1], strides = [1, 1]} : vector<16x2xf32> to vector<1x1xf32>
    %222 = vector.broadcast %221 : vector<1x1xf32> to vector<16x24xf32>
    %223 = arith.mulf %222, %218 : vector<16x24xf32>
    %224 = vector.extract_strided_slice %10 {offsets = [9, 1], sizes = [1, 1], strides = [1, 1]} : vector<16x2xf32> to vector<1x1xf32>
    %225 = vector.broadcast %224 : vector<1x1xf32> to vector<16x24xf32>
    %226 = arith.mulf %225, %220 : vector<16x24xf32>
    %227 = arith.addf %223, %226 : vector<16x24xf32>
    %228 = vector.extract_strided_slice %9 {offsets = [144, 0], sizes = [16, 24], strides = [1, 1]} : vector<256x24xf32> to vector<16x24xf32>
    %229 = arith.addf %228, %227 : vector<16x24xf32>
    %c144 = arith.constant 144 : index
    %c0_49 = arith.constant 0 : index
    %230 = vector.load %arg14[%c144, %c0_49] : memref<256x24xf32, #tpu.memory_space<vmem>>, vector<16x24xf32>
    tpu.vector_store %arg14[%c144, %c0_49], %229 {strides = array<i32>} : memref<256x24xf32, #tpu.memory_space<vmem>>, vector<16x24xf32>,
    %c16_i32_50 = arith.constant 16 : i32
    %231 = arith.muli %arg1, %c16_i32_50 : i32
    %c10_i32 = arith.constant 10 : i32
    %232 = arith.addi %231, %c10_i32 : i32
    %233 = arith.index_cast %232 : i32 to index
    %234 = memref.load %arg2[%233] : memref<16xi32, #tpu.memory_space<smem>>
    %235 = tpu.assume_multiple %234, 8 : i32
    %236 = arith.index_cast %232 : i32 to index
    %237 = memref.load %arg3[%236] : memref<16xi32, #tpu.memory_space<smem>>
    %238 = tpu.assume_multiple %237, 8 : i32
    %239 = arith.index_cast %235 : i32 to index
    %c0_51 = arith.constant 0 : index
    %240 = vector.load %arg13[%239, %c0_51] : memref<128x24xf32, #tpu.memory_space<vmem>>, vector<16x24xf32>
    %241 = arith.index_cast %238 : i32 to index
    %c0_52 = arith.constant 0 : index
    %242 = vector.load %arg13[%241, %c0_52] : memref<128x24xf32, #tpu.memory_space<vmem>>, vector<16x24xf32>
    %243 = vector.extract_strided_slice %10 {offsets = [10, 0], sizes = [1, 1], strides = [1, 1]} : vector<16x2xf32> to vector<1x1xf32>
    %244 = vector.broadcast %243 : vector<1x1xf32> to vector<16x24xf32>
    %245 = arith.mulf %244, %240 : vector<16x24xf32>
    %246 = vector.extract_strided_slice %10 {offsets = [10, 1], sizes = [1, 1], strides = [1, 1]} : vector<16x2xf32> to vector<1x1xf32>
    %247 = vector.broadcast %246 : vector<1x1xf32> to vector<16x24xf32>
    %248 = arith.mulf %247, %242 : vector<16x24xf32>
    %249 = arith.addf %245, %248 : vector<16x24xf32>
    %250 = vector.extract_strided_slice %9 {offsets = [160, 0], sizes = [16, 24], strides = [1, 1]} : vector<256x24xf32> to vector<16x24xf32>
    %251 = arith.addf %250, %249 : vector<16x24xf32>
    %c160 = arith.constant 160 : index
    %c0_53 = arith.constant 0 : index
    %252 = vector.load %arg14[%c160, %c0_53] : memref<256x24xf32, #tpu.memory_space<vmem>>, vector<16x24xf32>
    tpu.vector_store %arg14[%c160, %c0_53], %251 {strides = array<i32>} : memref<256x24xf32, #tpu.memory_space<vmem>>, vector<16x24xf32>,
    %c16_i32_54 = arith.constant 16 : i32
    %253 = arith.muli %arg1, %c16_i32_54 : i32
    %c11_i32 = arith.constant 11 : i32
    %254 = arith.addi %253, %c11_i32 : i32
    %255 = arith.index_cast %254 : i32 to index
    %256 = memref.load %arg2[%255] : memref<16xi32, #tpu.memory_space<smem>>
    %257 = tpu.assume_multiple %256, 8 : i32
    %258 = arith.index_cast %254 : i32 to index
    %259 = memref.load %arg3[%258] : memref<16xi32, #tpu.memory_space<smem>>
    %260 = tpu.assume_multiple %259, 8 : i32
    %261 = arith.index_cast %257 : i32 to index
    %c0_55 = arith.constant 0 : index
    %262 = vector.load %arg13[%261, %c0_55] : memref<128x24xf32, #tpu.memory_space<vmem>>, vector<16x24xf32>
    %263 = arith.index_cast %260 : i32 to index
    %c0_56 = arith.constant 0 : index
    %264 = vector.load %arg13[%263, %c0_56] : memref<128x24xf32, #tpu.memory_space<vmem>>, vector<16x24xf32>
    %265 = vector.extract_strided_slice %10 {offsets = [11, 0], sizes = [1, 1], strides = [1, 1]} : vector<16x2xf32> to vector<1x1xf32>
    %266 = vector.broadcast %265 : vector<1x1xf32> to vector<16x24xf32>
    %267 = arith.mulf %266, %262 : vector<16x24xf32>
    %268 = vector.extract_strided_slice %10 {offsets = [11, 1], sizes = [1, 1], strides = [1, 1]} : vector<16x2xf32> to vector<1x1xf32>
    %269 = vector.broadcast %268 : vector<1x1xf32> to vector<16x24xf32>
    %270 = arith.mulf %269, %264 : vector<16x24xf32>
    %271 = arith.addf %267, %270 : vector<16x24xf32>
    %272 = vector.extract_strided_slice %9 {offsets = [176, 0], sizes = [16, 24], strides = [1, 1]} : vector<256x24xf32> to vector<16x24xf32>
    %273 = arith.addf %272, %271 : vector<16x24xf32>
    %c176 = arith.constant 176 : index
    %c0_57 = arith.constant 0 : index
    %274 = vector.load %arg14[%c176, %c0_57] : memref<256x24xf32, #tpu.memory_space<vmem>>, vector<16x24xf32>
    tpu.vector_store %arg14[%c176, %c0_57], %273 {strides = array<i32>} : memref<256x24xf32, #tpu.memory_space<vmem>>, vector<16x24xf32>,
    %c16_i32_58 = arith.constant 16 : i32
    %275 = arith.muli %arg1, %c16_i32_58 : i32
    %c12_i32 = arith.constant 12 : i32
    %276 = arith.addi %275, %c12_i32 : i32
    %277 = arith.index_cast %276 : i32 to index
    %278 = memref.load %arg2[%277] : memref<16xi32, #tpu.memory_space<smem>>
    %279 = tpu.assume_multiple %278, 8 : i32
    %280 = arith.index_cast %276 : i32 to index
    %281 = memref.load %arg3[%280] : memref<16xi32, #tpu.memory_space<smem>>
    %282 = tpu.assume_multiple %281, 8 : i32
    %283 = arith.index_cast %279 : i32 to index
    %c0_59 = arith.constant 0 : index
    %284 = vector.load %arg13[%283, %c0_59] : memref<128x24xf32, #tpu.memory_space<vmem>>, vector<16x24xf32>
    %285 = arith.index_cast %282 : i32 to index
    %c0_60 = arith.constant 0 : index
    %286 = vector.load %arg13[%285, %c0_60] : memref<128x24xf32, #tpu.memory_space<vmem>>, vector<16x24xf32>
    %287 = vector.extract_strided_slice %10 {offsets = [12, 0], sizes = [1, 1], strides = [1, 1]} : vector<16x2xf32> to vector<1x1xf32>
    %288 = vector.broadcast %287 : vector<1x1xf32> to vector<16x24xf32>
    %289 = arith.mulf %288, %284 : vector<16x24xf32>
    %290 = vector.extract_strided_slice %10 {offsets = [12, 1], sizes = [1, 1], strides = [1, 1]} : vector<16x2xf32> to vector<1x1xf32>
    %291 = vector.broadcast %290 : vector<1x1xf32> to vector<16x24xf32>
    %292 = arith.mulf %291, %286 : vector<16x24xf32>
    %293 = arith.addf %289, %292 : vector<16x24xf32>
    %294 = vector.extract_strided_slice %9 {offsets = [192, 0], sizes = [16, 24], strides = [1, 1]} : vector<256x24xf32> to vector<16x24xf32>
    %295 = arith.addf %294, %293 : vector<16x24xf32>
    %c192 = arith.constant 192 : index
    %c0_61 = arith.constant 0 : index
    %296 = vector.load %arg14[%c192, %c0_61] : memref<256x24xf32, #tpu.memory_space<vmem>>, vector<16x24xf32>
    tpu.vector_store %arg14[%c192, %c0_61], %295 {strides = array<i32>} : memref<256x24xf32, #tpu.memory_space<vmem>>, vector<16x24xf32>,
    %c16_i32_62 = arith.constant 16 : i32
    %297 = arith.muli %arg1, %c16_i32_62 : i32
    %c13_i32 = arith.constant 13 : i32
    %298 = arith.addi %297, %c13_i32 : i32
    %299 = arith.index_cast %298 : i32 to index
    %300 = memref.load %arg2[%299] : memref<16xi32, #tpu.memory_space<smem>>
    %301 = tpu.assume_multiple %300, 8 : i32
    %302 = arith.index_cast %298 : i32 to index
    %303 = memref.load %arg3[%302] : memref<16xi32, #tpu.memory_space<smem>>
    %304 = tpu.assume_multiple %303, 8 : i32
    %305 = arith.index_cast %301 : i32 to index
    %c0_63 = arith.constant 0 : index
    %306 = vector.load %arg13[%305, %c0_63] : memref<128x24xf32, #tpu.memory_space<vmem>>, vector<16x24xf32>
    %307 = arith.index_cast %304 : i32 to index
    %c0_64 = arith.constant 0 : index
    %308 = vector.load %arg13[%307, %c0_64] : memref<128x24xf32, #tpu.memory_space<vmem>>, vector<16x24xf32>
    %309 = vector.extract_strided_slice %10 {offsets = [13, 0], sizes = [1, 1], strides = [1, 1]} : vector<16x2xf32> to vector<1x1xf32>
    %310 = vector.broadcast %309 : vector<1x1xf32> to vector<16x24xf32>
    %311 = arith.mulf %310, %306 : vector<16x24xf32>
    %312 = vector.extract_strided_slice %10 {offsets = [13, 1], sizes = [1, 1], strides = [1, 1]} : vector<16x2xf32> to vector<1x1xf32>
    %313 = vector.broadcast %312 : vector<1x1xf32> to vector<16x24xf32>
    %314 = arith.mulf %313, %308 : vector<16x24xf32>
    %315 = arith.addf %311, %314 : vector<16x24xf32>
    %316 = vector.extract_strided_slice %9 {offsets = [208, 0], sizes = [16, 24], strides = [1, 1]} : vector<256x24xf32> to vector<16x24xf32>
    %317 = arith.addf %316, %315 : vector<16x24xf32>
    %c208 = arith.constant 208 : index
    %c0_65 = arith.constant 0 : index
    %318 = vector.load %arg14[%c208, %c0_65] : memref<256x24xf32, #tpu.memory_space<vmem>>, vector<16x24xf32>
    tpu.vector_store %arg14[%c208, %c0_65], %317 {strides = array<i32>} : memref<256x24xf32, #tpu.memory_space<vmem>>, vector<16x24xf32>,
    %c16_i32_66 = arith.constant 16 : i32
    %319 = arith.muli %arg1, %c16_i32_66 : i32
    %c14_i32 = arith.constant 14 : i32
    %320 = arith.addi %319, %c14_i32 : i32
    %321 = arith.index_cast %320 : i32 to index
    %322 = memref.load %arg2[%321] : memref<16xi32, #tpu.memory_space<smem>>
    %323 = tpu.assume_multiple %322, 8 : i32
    %324 = arith.index_cast %320 : i32 to index
    %325 = memref.load %arg3[%324] : memref<16xi32, #tpu.memory_space<smem>>
    %326 = tpu.assume_multiple %325, 8 : i32
    %327 = arith.index_cast %323 : i32 to index
    %c0_67 = arith.constant 0 : index
    %328 = vector.load %arg13[%327, %c0_67] : memref<128x24xf32, #tpu.memory_space<vmem>>, vector<16x24xf32>
    %329 = arith.index_cast %326 : i32 to index
    %c0_68 = arith.constant 0 : index
    %330 = vector.load %arg13[%329, %c0_68] : memref<128x24xf32, #tpu.memory_space<vmem>>, vector<16x24xf32>
    %331 = vector.extract_strided_slice %10 {offsets = [14, 0], sizes = [1, 1], strides = [1, 1]} : vector<16x2xf32> to vector<1x1xf32>
    %332 = vector.broadcast %331 : vector<1x1xf32> to vector<16x24xf32>
    %333 = arith.mulf %332, %328 : vector<16x24xf32>
    %334 = vector.extract_strided_slice %10 {offsets = [14, 1], sizes = [1, 1], strides = [1, 1]} : vector<16x2xf32> to vector<1x1xf32>
    %335 = vector.broadcast %334 : vector<1x1xf32> to vector<16x24xf32>
    %336 = arith.mulf %335, %330 : vector<16x24xf32>
    %337 = arith.addf %333, %336 : vector<16x24xf32>
    %338 = vector.extract_strided_slice %9 {offsets = [224, 0], sizes = [16, 24], strides = [1, 1]} : vector<256x24xf32> to vector<16x24xf32>
    %339 = arith.addf %338, %337 : vector<16x24xf32>
    %c224 = arith.constant 224 : index
    %c0_69 = arith.constant 0 : index
    %340 = vector.load %arg14[%c224, %c0_69] : memref<256x24xf32, #tpu.memory_space<vmem>>, vector<16x24xf32>
    tpu.vector_store %arg14[%c224, %c0_69], %339 {strides = array<i32>} : memref<256x24xf32, #tpu.memory_space<vmem>>, vector<16x24xf32>,
    %c16_i32_70 = arith.constant 16 : i32
    %341 = arith.muli %arg1, %c16_i32_70 : i32
    %c15_i32 = arith.constant 15 : i32
    %342 = arith.addi %341, %c15_i32 : i32
    %343 = arith.index_cast %342 : i32 to index
    %344 = memref.load %arg2[%343] : memref<16xi32, #tpu.memory_space<smem>>
    %345 = tpu.assume_multiple %344, 8 : i32
    %346 = arith.index_cast %342 : i32 to index
    %347 = memref.load %arg3[%346] : memref<16xi32, #tpu.memory_space<smem>>
    %348 = tpu.assume_multiple %347, 8 : i32
    %349 = arith.index_cast %345 : i32 to index
    %c0_71 = arith.constant 0 : index
    %350 = vector.load %arg13[%349, %c0_71] : memref<128x24xf32, #tpu.memory_space<vmem>>, vector<16x24xf32>
    %351 = arith.index_cast %348 : i32 to index
    %c0_72 = arith.constant 0 : index
    %352 = vector.load %arg13[%351, %c0_72] : memref<128x24xf32, #tpu.memory_space<vmem>>, vector<16x24xf32>
    %353 = vector.extract_strided_slice %10 {offsets = [15, 0], sizes = [1, 1], strides = [1, 1]} : vector<16x2xf32> to vector<1x1xf32>
    %354 = vector.broadcast %353 : vector<1x1xf32> to vector<16x24xf32>
    %355 = arith.mulf %354, %350 : vector<16x24xf32>
    %356 = vector.extract_strided_slice %10 {offsets = [15, 1], sizes = [1, 1], strides = [1, 1]} : vector<16x2xf32> to vector<1x1xf32>
    %357 = vector.broadcast %356 : vector<1x1xf32> to vector<16x24xf32>
    %358 = arith.mulf %357, %352 : vector<16x24xf32>
    %359 = arith.addf %355, %358 : vector<16x24xf32>
    %360 = vector.extract_strided_slice %9 {offsets = [240, 0], sizes = [16, 24], strides = [1, 1]} : vector<256x24xf32> to vector<16x24xf32>
    %361 = arith.addf %360, %359 : vector<16x24xf32>
    %c240 = arith.constant 240 : index
    %c0_73 = arith.constant 0 : index
    %362 = vector.load %arg14[%c240, %c0_73] : memref<256x24xf32, #tpu.memory_space<vmem>>, vector<16x24xf32>
    tpu.vector_store %arg14[%c240, %c0_73], %361 {strides = array<i32>} : memref<256x24xf32, #tpu.memory_space<vmem>>, vector<16x24xf32>,
    %c0_74 = arith.constant 0 : index
    %c0_75 = arith.constant 0 : index
    %363 = vector.load %arg14[%c0_74, %c0_75] : memref<256x24xf32, #tpu.memory_space<vmem>>, vector<256x24xf32>
    %364 = tpu.transpose %363, [1, 0] : vector<256x24xf32> -> vector<24x256xf32>
    %c0_76 = arith.constant 0 : index
    %c0_77 = arith.constant 0 : index
    %c0_78 = arith.constant 0 : index
    %365 = vector.load %arg12[%c0_76, %c0_77, %c0_78] : memref<1x24x256xf32, #tpu.memory_space<vmem>>, vector<1x24x256xf32>
    %366 = vector.shape_cast %365 : vector<1x24x256xf32> to vector<24x256xf32>
    %367 = vector.shape_cast %364 : vector<24x256xf32> to vector<1x24x256xf32>
    tpu.vector_store %arg12[%c0_76, %c0_77, %c0_78], %367 {strides = array<i32>} : memref<1x24x256xf32, #tpu.memory_space<vmem>>, vector<1x24x256xf32>,
    return
  }
  func.func @transform_0(%arg0: i32, %arg1: i32, %arg2: memref<16xi32, #tpu.memory_space<smem>>, %arg3: memref<16xi32, #tpu.memory_space<smem>>) -> (i32, i32) {
    %c0_i32 = arith.constant 0 : i32
    %c0_i32_0 = arith.constant 0 : i32
    return %arg1, %c0_i32 : i32, i32
  }
  func.func @transform_1(%arg0: i32, %arg1: i32, %arg2: memref<16xi32, #tpu.memory_space<smem>>, %arg3: memref<16xi32, #tpu.memory_space<smem>>) -> (i32, i32, i32) {
    %c0_i32 = arith.constant 0 : i32
    %c0_i32_0 = arith.constant 0 : i32
    return %arg0, %arg1, %c0_i32 : i32, i32, i32
  }
  func.func @transform_2(%arg0: i32, %arg1: i32, %arg2: memref<16xi32, #tpu.memory_space<smem>>, %arg3: memref<16xi32, #tpu.memory_space<smem>>) -> (i32, i32, i32) {
    %c0_i32 = arith.constant 0 : i32
    %c0_i32_0 = arith.constant 0 : i32
    %c0_i32_1 = arith.constant 0 : i32
    return %arg0, %c0_i32, %c0_i32_0 : i32, i32, i32
  }
  func.func @transform_3(%arg0: i32, %arg1: i32, %arg2: memref<16xi32, #tpu.memory_space<smem>>, %arg3: memref<16xi32, #tpu.memory_space<smem>>) -> (i32, i32) {
    %c0_i32 = arith.constant 0 : i32
    %c0_i32_0 = arith.constant 0 : i32
    %c0_i32_1 = arith.constant 0 : i32
    return %c0_i32, %c0_i32_0 : i32, i32
  }
  func.func @transform_4(%arg0: i32, %arg1: i32, %arg2: memref<16xi32, #tpu.memory_space<smem>>, %arg3: memref<16xi32, #tpu.memory_space<smem>>) -> (i32, i32) {
    %c0_i32 = arith.constant 0 : i32
    %c0_i32_0 = arith.constant 0 : i32
    %c0_i32_1 = arith.constant 0 : i32
    return %c0_i32, %c0_i32_0 : i32, i32
  }
  func.func @transform_5(%arg0: i32, %arg1: i32, %arg2: memref<16xi32, #tpu.memory_space<smem>>, %arg3: memref<16xi32, #tpu.memory_space<smem>>) -> (i32, i32) {
    %c0_i32 = arith.constant 0 : i32
    %c0_i32_0 = arith.constant 0 : i32
    %c0_i32_1 = arith.constant 0 : i32
    return %c0_i32, %c0_i32_0 : i32, i32
  }
  func.func @transform_6(%arg0: i32, %arg1: i32, %arg2: memref<16xi32, #tpu.memory_space<smem>>, %arg3: memref<16xi32, #tpu.memory_space<smem>>) -> (i32, i32) {
    %c0_i32 = arith.constant 0 : i32
    %c0_i32_0 = arith.constant 0 : i32
    %c0_i32_1 = arith.constant 0 : i32
    return %c0_i32, %c0_i32_0 : i32, i32
  }
  func.func @transform_7(%arg0: i32, %arg1: i32, %arg2: memref<16xi32, #tpu.memory_space<smem>>, %arg3: memref<16xi32, #tpu.memory_space<smem>>) -> (i32, i32) {
    %c0_i32 = arith.constant 0 : i32
    %c0_i32_0 = arith.constant 0 : i32
    %c0_i32_1 = arith.constant 0 : i32
    return %c0_i32, %c0_i32_0 : i32, i32
  }
  func.func @transform_8(%arg0: i32, %arg1: i32, %arg2: memref<16xi32, #tpu.memory_space<smem>>, %arg3: memref<16xi32, #tpu.memory_space<smem>>) -> (i32, i32, i32) {
    %c0_i32 = arith.constant 0 : i32
    %c0_i32_0 = arith.constant 0 : i32
    return %arg0, %c0_i32, %arg1 : i32, i32, i32
  }
}

</mosaic_0001>

<bundles_post_ra>
// kernel: tpu_custom_call.1
= control target key start
LH: loop header
LB: loop body
LE: loop exit
PB: predicated region body
PF: predicated region fallthrough
CT: control target
= control target key end

     0   :  { %s3794_s0 = inlined_call_operand.vmem [shape: s32[16], index: 0, kind: input, shape index: {}]   ;;  %s3795_s2 = inlined_call_operand.vmem [shape: f32[16,2], index: 2, kind: input, shape index: {}]   ;;  %s3796_s3 = inlined_call_operand.vmem [shape: f32[2,256,48], index: 3, kind: input, shape index: {}]   ;;  %s3797_s4 = inlined_call_operand.vmem [shape: f32[2,64,192], index: 4, kind: input, shape index: {}]   ;;  %s3798_s5 = inlined_call_operand.vmem [shape: f32[48,24], index: 5, kind: input, shape index: {}]   ;;  %s3799_s6 = inlined_call_operand.vmem [shape: f32[192,24], index: 6, kind: input, shape index: {}]   ;;  %s3800_s7 = inlined_call_operand.vmem [shape: f32[1,24], index: 7, kind: input, shape index: {}]   ;;  %s3801_s8 = inlined_call_operand.vmem [shape: f32[1,24], index: 8, kind: input, shape index: {}]   ;;  %s3802_s9 = inlined_call_operand.vmem [shape: f32[16,8], index: 9, kind: input, shape index: {}]   ;;  %s3803_s10 = inlined_call_operand.hbm [shape: f32[2,24,256], index: 10, kind: output, shape index: {}]   ;;  %s3804_s1 = inlined_call_operand.vmem [shape: s32[16], index: 1, kind: input, shape index: {}]  }
   0x1   :  { %3837 = sst [smem:[#allocation34_spill]] %s3795_s2  ;;  %s15_s15 = sshll.u32 %s3794_s0, 4  ;;  %s16_s15 = int_to_ptr.vmem [resolvable:$true] %s15_s15 }
   0x2   :  { %3838 = sst [smem:[#allocation35_spill]] %s3796_s3  ;;  %s19_s18 = sshll.u32 %s3804_s1, 4  ;;  %s20_s18 = int_to_ptr.vmem [resolvable:$true] %s19_s18 }
   0x3   :  { %3839 = sst [smem:[#allocation36_spill]] %s3797_s4  ;;  %s2674_s19 = scalar_lea.vmem %s16_s15, 16 }
   0x4   :  { %3840 = sst [smem:[#allocation37_spill]] %s3798_s5  ;;  %p2675_p0 = scmp.ne.s32.totalorder %s16_s15, %s2674_s19 }
   0x5   :  { %3841 = sst [smem:[#allocation38_spill]] %s3799_s6  ;;  %p2679_p1 = scmp.lt.s32.totalorder %s16_s15, %s16_s15 }
   0x6   :  { %3842 = sst [smem:[#allocation39_spill]] %s3800_s7  ;;  %p2680_p2 = scmp.lt.s32.totalorder %s2674_s19, %s2674_s19 }
   0x7   :  { %3843 = sst [smem:[#allocation40_spill]] %s3801_s8 }
   0x8   :  { %3844 = sst [smem:[#allocation41_spill]] %s3802_s9  ;;  %p2681_p3 = por %p2680_p2, %p2679_p1 }
   0x9   :  { %3845 = sst [smem:[#allocation42_spill]] %s3803_s10 }
   0xa   :  { %p2682_p4 = pnand %p2681_p3, %p2675_p0 }
   0xc   :  { %2685 = shalt.err (!%p2682_p4)  }
   0xd   :  { %s2778_s20 = smov [#allocation5]   ;;  %s2686_s21 = scalar_lea.vmem %s20_s18, 16 }
   0xe   :  { %18 = dma.vmem_to_smem %s16_s15, 16, %s2778_s20, [#allocation4] }
   0xf   :  { %p2687_p5 = scmp.ne.s32.totalorder %s20_s18, %s2686_s21  ;;  %p2691_p6 = scmp.lt.s32.totalorder %s20_s18, %s20_s18 }
  0x10   :  { %p2692_p7 = scmp.lt.s32.totalorder %s2686_s21, %s2686_s21 }
  0x12   :  { %p2693_p8 = por %p2692_p7, %p2691_p6 }
  0x14   :  { %p2694_p9 = pnand %p2693_p8, %p2687_p5 }
  0x16   :  { %2697 = shalt.err (!%p2694_p9)  }
  0x17   :  { %s2779_s0 = smov [#allocation6]  }
  0x18   :  { %22 = dma.vmem_to_smem %s20_s18, 16, %s2779_s0, [#allocation4] }
  0x19   :  { %2748 = dma.done.wait [#allocation4], 32 }
  0x1a   :  { %2749 = vsyncadd [#allocation4], 4294967264 }
  0x1b   :  { %24 = sfence }
  0x1c   :  { %25 = vsyncpa [#allocation8], 0 }
  0x1d   :  { %27 = vsyncpa [#allocation8 + $0x1], 0  ;;  %s2846_s1 = smov 0   ;;  %s2848_s22 = smov 0  }
  0x1e   :  { %s2850_s23 = smov 0   ;;  %s2852_s24 = smov 0  }
  0x1f   :  { %s2854_s25 = smov 0   ;;  %s2856_s26 = smov 0  }
  0x20 LB: > { %3846 = sst [smem:[#allocation11_spill]] %s2756_s1  ;;  %s2270_s27 = sadd.s32 4294967295, %s2776_s26   ;;  %s2776_s26 = sphi %s2856_s26, %s33_s26   ;;  %s2772_s25 = sphi %s2854_s25, %s3906_s25   ;;  %s2768_s24 = sphi %s2852_s24, %s3905_s24   ;;  %s2764_s23 = sphi %s2850_s23, %s3904_s23   ;;  %s2760_s22 = sphi %s2848_s22, %s3903_s22   ;;  %s2756_s1 = sphi %s2846_s1, %s3902_s1  }
  0x21   : > { %3847 = sst [smem:[#allocation12_spill]] %s2760_s22  ;;  %s2271_s28 = sadd.s32 4294967294, %s2776_s26  }
  0x22   : > { %3848 = sst [smem:[#allocation13_spill]] %s2764_s23  ;;  %s45_s29 = sadd.s32 1, %s2772_s25 }
  0x23   : > { %3849 = sst [smem:[#allocation14_spill]] %s2768_s24  ;;  %s239_s30 = sadd.s32 1, %s2764_s23 }
  0x24   : > { %3850 = sst [smem:[#allocation15_spill]] %s2772_s25  ;;  %p47_p10 = scmp.ge.s32.totalorder %s45_s29, 2 }
  0x25   : > { %3851 = sst [smem:[#allocation16_spill]] %s2776_s26  ;;  %p249_p11 = scmp.ne.s32.totalorder %s2764_s23, %s2760_s22 }
  0x26   : > { %p250_p12 = scmp.eq.s32.totalorder %s2270_s27, 1  ;;  %p255_p13 = scmp.ne.s32.totalorder %s2760_s22, %s2756_s1 }
  0x27   : > { %s3908_s29 = smov (%p47_p10, %s45_s29), 0  ;;  %p256_p1 = scmp.eq.s32.totalorder %s2271_s28, 1 }
  0x28   : > { %3852 = sst [smem:[#allocation17_spill]] %s3908_s29  ;;  %p2886_p0 = por %p250_p12, %p249_p11 }
  0x29   : > { %s234_s12 = ssub.s32 %s2772_s25, %s3908_s29  ;;  %p2275_p2 = scmp.ge.s32.totalorder %s2776_s26, 1 }
  0x2a   : > { %s3853_s11 = scalar_select %p2886_p0, 1, 0 }
  0x2b   : > { %p237_p3 = scmp.eq.s32.totalorder %s234_s12, 0  ;;  %p2893_p4 = por %p256_p1, %p255_p13 }
  0x2c   : > { %3854 = sst [smem:[#allocation18_spill]] %s3853_s11  ;;  %p319_p5 = scmp.lt.s32.totalorder %s2776_s26, 3 }
  0x2d   : > { %s3855_s13 = scalar_select %p2893_p4, 1, 0 }
  0x2e   : > { %s2899_s14 = scalar_select %p237_p3, %s2764_s23, %s239_s30  }
  0x2f   : > { %3856 = sst [smem:[#allocation19_spill]] %s3855_s13  ;;  %p320_p6 = pnand %p2275_p2, %p319_p5 }
  0x30   : > { %3857 = sst [smem:[#allocation20_spill]] %s2899_s14 }
  0x31   : > { %323 = sbr.rel (%p320_p6) target bundleno = 724 (0x2d4), region = 52 }
  0x36   : > { %s3858_s6 = sld [smem:[#allocation38_spill]]  ;;  %p374_p7 = scmp.lt.s32.totalorder %s2768_s24, 1  ;;  %v2780_v1 = vmov 0.0   ;;  %vm440_vm0 = vcmask 523264   ;;  %vm572_vm1 = vcmask 64512   ;;  %vm1241_vm2 = vcmask 392192  }
  0x37   : > { %465 = vmatprep.subr.mxu0 %v2780_v1  ;;  %s3859_s4 = sld [smem:[#allocation36_spill]]  ;;  %vm654_vm3 = vcmask 195584  }
  0x38   : > { %s2910_s19 = scalar_select %p374_p7, %s2768_s24, 1 }
  0x39   : > { %s3860_s9 = sld [smem:[#allocation41_spill]] }
  0x3a   : > { %s2372_s0 = sshll.u32 %s2910_s19, 7  ;;  %s3861_s5 = sld [smem:[#allocation37_spill]] }
  0x3b   : > { %s2371_s28 = sshll.u32 %s2910_s19, 8  ;;  %s3862_s3 = sld [smem:[#allocation35_spill]] }
  0x3c   : > { %v424_v0 = vld [vmem:[%s3858_s6 + $0x78] sm:$0xff]  ;;  %v423_v2 = vld [vmem:[%s3858_s6 + $0x70] sm:$0xff]  ;;  %v422_v3 = vld [vmem:[%s3858_s6 + $0x68] sm:$0xff]  ;;  %s3863_s2 = sld [smem:[#allocation34_spill]] }
  0x3d   : > { %466 = vmatpush1.msra.mxu0 %v424_v0  ;;  %v421_v4 = vld [vmem:[%s3858_s6 + $0x60] sm:$0xff]  ;;  %s2924_s15 = scalar_lea.vmem %s3859_s4, %s2372_s0  ;;  %v420_v5 = vld [vmem:[%s3858_s6 + $0x58] sm:$0xff]  ;;  %v419_v7 = vld [vmem:[%s3858_s6 + $0x50] sm:$0xff]  ;;  %s3864_s8 = sld [smem:[#allocation40_spill]] }
  0x3e   : > { %467 = vmatprep.subr.mxu0 %v2780_v1  ;;  %v394_v6 = vld [vmem:[%s2924_s15 + $0x8] sm:$0xff]  ;;  %v417_v9 = vld [vmem:[%s3858_s6 + $0x40] sm:$0xff]  ;;  %v416_v10 = vld [vmem:[%s3858_s6 + $0x38] sm:$0xff]  ;;  %s3329_s4 = sld [smem:[#allocation6]] }
  0x3f   : > { %468 = vmatpush1.msra.mxu0 %v423_v2  ;;  %2281 = vmatprep.mubr.msk.f32.mxu0 %vm440_vm0, %v394_v6  ;;  %v418_v8 = vld [vmem:[%s3858_s6 + $0x48] sm:$0xff]  ;;  %v415_v11 = vld [vmem:[%s3858_s6 + $0x30] sm:$0xff]  ;;  %v413_v13 = vld [vmem:[%s3858_s6 + $0x20] sm:$0xff]  ;;  %s3341_s29 = sld [smem:[#allocation5 + $0x2]] }
  0x40   : > { %469 = vmatprep.subr.mxu0 %v2780_v1  ;;  %v414_v12 = vld [vmem:[%s3858_s6 + $0x28] sm:$0xff]  ;;  %v412_v14 = vld [vmem:[%s3858_s6 + $0x18] sm:$0xff]  ;;  %v411_v15 = vld [vmem:[%s3858_s6 + $0x10] sm:$0xff]  ;;  %s3346_s14 = sld [smem:[#allocation6 + $0x2]] }
  0x41   : > { %470 = vmatpush1.msra.mxu0 %v422_v3  ;;  %v410_v16 = vld [vmem:[%s3858_s6 + $0x8] sm:$0xff]  ;;  %v409_v17 = vld [vmem:[%s3858_s6] sm:$0xff]  ;;  %v432_v18 = vld [vmem:[%s3858_s6 + $0xb8] sm:$0xff]  ;;  %s3069_s18 = scalar_lea.vmem %s3862_s3, %s2371_s28  ;;  %s2781_s28 = smov 127  }
  0x42   : > { %471 = vmatprep.subr.mxu0 %v2780_v1  ;;  %v431_v19 = vld [vmem:[%s3858_s6 + $0xb0] sm:$0xff]  ;;  %v430_v20 = vld [vmem:[%s3858_s6 + $0xa8] sm:$0xff]  ;;  %v429_v21 = vld [vmem:[%s3858_s6 + $0xa0] sm:$0xff]  ;;  %s3351_s13 = sld [smem:[#allocation5 + $0x3]] }
  0x43   : > { %472 = vmatpush1.msra.mxu0 %v421_v4  ;;  %v428_v22 = vld [vmem:[%s3858_s6 + $0x98] sm:$0xff]  ;;  %v427_v23 = vld [vmem:[%s3858_s6 + $0x90] sm:$0xff]  ;;  %v426_v24 = vld [vmem:[%s3858_s6 + $0x88] sm:$0xff]  ;;  %s3356_s26 = sld [smem:[#allocation6 + $0x3]] }
  0x44   : > { %473 = vmatprep.subr.mxu0 %v2780_v1  ;;  %v425_v25 = vld [vmem:[%s3858_s6 + $0x80] sm:$0xff]  ;;  %v396_v27 = vld [vmem:[%s2924_s15 + $0x18] sm:$0xff]  ;;  %v395_v28 = vld [vmem:[%s2924_s15 + $0x10] sm:$0xff]  ;;  %s3877_s7 = sld [smem:[#allocation39_spill]] }
  0x45   : > { %474 = vmatpush1.msra.mxu0 %v420_v5  ;;  %v393_v26 = vld [vmem:[%s2924_s15] sm:$0xff]  ;;  %v398_v29 = vld [vmem:[%s2924_s15 + $0x28] sm:$0xff]  ;;  %v400_v31 = vld [vmem:[%s2924_s15 + $0x38] sm:$0xff]  ;;  %3871 = sst [smem:[#allocation27_spill]] %s3341_s29 }
  0x46   : > { %475 = vmatprep.subr.mxu0 %v2780_v1  ;;  %v397_v30 = vld [vmem:[%s2924_s15 + $0x20] sm:$0xff]  ;;  %v399_v32 = vld [vmem:[%s2924_s15 + $0x30] sm:$0xff]  ;;  %v402_v33 = vld [vmem:[%s2924_s15 + $0x48] sm:$0xff]  ;;  %3873 = sst [smem:[#allocation29_spill]] %s3346_s14 }
  0x47   : > { %476 = vmatpush1.msra.mxu0 %v419_v7  ;;  %v401_v34 = vld [vmem:[%s2924_s15 + $0x40] sm:$0xff]  ;;  %v404_v35 = vld [vmem:[%s2924_s15 + $0x58] sm:$0xff]  ;;  %v403_v36 = vld [vmem:[%s2924_s15 + $0x50] sm:$0xff]  ;;  %s3363_s24 = sld [smem:[#allocation5 + $0x4]] }
  0x48   : > { %477 = vmatprep.subr.mxu0 %v2780_v1  ;;  %v406_v37 = vld [vmem:[%s2924_s15 + $0x68] sm:$0xff]  ;;  %v405_v38 = vld [vmem:[%s2924_s15 + $0x60] sm:$0xff]  ;;  %v408_v39 = vld [vmem:[%s2924_s15 + $0x78] sm:$0xff]  ;;  %3875 = sst [smem:[#allocation31_spill]] %s3351_s13 }
  0x49   : > { %478 = vmatpush1.msra.mxu0 %v418_v8  ;;  %v407_v40 = vld [vmem:[%s2924_s15 + $0x70] sm:$0xff]  ;;  %v3034_v41 = vld [vmem:[%s3860_s9] sm:$0xff]  ;;  %v3041_v42 = vld [vmem:[%s3861_s5 + $0x28] sm:$0xff]  ;;  %s3367_s13 = sld [smem:[#allocation6 + $0x4]] }
  0x4a   : > { %479 = vmatprep.subr.mxu0 %v2780_v1  ;;  %2437 = vmatprep.mubr.msk.f32.mxu1 %vm572_vm1, %v3034_v41  ;;  %v3048_v43 = vld [vmem:[%s3861_s5 + $0x20] sm:$0xff]  ;;  %v3055_v44 = vld [vmem:[%s3861_s5 + $0x18] sm:$0xff]  ;;  %v3063_v45 = vld [vmem:[%s3861_s5 + $0x10] sm:$0xff]  ;;  %s3369_s14 = sld [smem:[#allocation5 + $0x5]] }
  0x4b   : > { %480 = vmatpush1.msra.mxu0 %v417_v9  ;;  %v3075_v46 = vld [vmem:[%s3861_s5 + $0x8] sm:$0xff]  ;;  %v3082_v47 = vld [vmem:[%s3861_s5] sm:$0xff]  ;;  %v1198_v50 = vld [vmem:[%s3069_s18 + $0x10] sm:$0xff]  ;;  %s3331_s5 = sld [smem:[#allocation5 + $0x1]] }
  0x4c   : > { %481 = vmatprep.subr.mxu0 %v2780_v1  ;;  %v1196_v48 = vld [vmem:[%s3069_s18] sm:$0xff]  ;;  %v1197_v49 = vld [vmem:[%s3069_s18 + $0x8] sm:$0xff]  ;;  %v1199_v51 = vld [vmem:[%s3069_s18 + $0x18] sm:$0xff]  ;;  %s3378_s10 = sld [smem:[#allocation6 + $0x5]] }
  0x4d   : > { %482 = vmatpush1.msra.mxu0 %v416_v10  ;;  %v3097_v52 = vld [vmem:[%s3863_s2] sm:$0xff]  ;;  %v1201_v55 = vld [vmem:[%s3069_s18 + $0x28] sm:$0xff]  ;;  %s3384_s11 = sld [smem:[#allocation5 + $0x6]] }
  0x4e   : > { %483 = vmatprep.subr.mxu0 %v2780_v1  ;;  %v1631_v53 = vrot.slane %v3097_v52, 2  ;;  %2548 = vpush %v3097_v52  ;;  %v1200_v54 = vld [vmem:[%s3069_s18 + $0x20] sm:$0xff]  ;;  %1580 = vrot.lane.b32.xlu0 %v3097_v52, %s2781_s28  ;;  %v1659_v56 = vrot.slane %v3097_v52, 3  ;;  %v1603_v57 = vrot.slane %v3097_v52, 1  ;;  %v1715_v58 = vrot.slane %v3097_v52, 5  ;;  %v3137_v62 = vld [vmem:[%s3863_s2 + $0x8] sm:$0xff] }
  0x4f   : > { %484 = vmatpush1.msra.mxu0 %v415_v11  ;;  %v1687_v59 = vrot.slane %v3097_v52, 4  ;;  %v1771_v60 = vrot.slane %v3097_v52, 7  ;;  %v1743_v61 = vrot.slane %v3097_v52, 6  ;;  %v1827_v63 = vrot.slane %v3137_v62, 1  ;;  %v2280_v6 = vld [vmem:[%s3864_s8] ss:$0 sm:$0xff] }
  0x50   : > { %485 = vmatprep.subr.mxu0 %v2780_v1  ;;  %1637 = vrot.lane.b32.xlu1 %v1631_v53, %s2781_s28  ;;  %v1883_v0 = vrot.slane %v3137_v62, 3  ;;  %v1939_v2 = vrot.slane %v3137_v62, 5  ;;  %v1911_v3 = vrot.slane %v3137_v62, 4  ;;  %v1995_v4 = vrot.slane %v3137_v62, 7  ;;  %v571_v10 = vld [vmem:[%s3860_s9 + $0x8] sm:$0xff]  ;;  %s3324_s2 = sld [smem:[#allocation5]] }
  0x51   : > { %486 = vmatpush1.msra.mxu0 %v414_v12  ;;  %v1967_v5 = vrot.slane %v3137_v62, 6  ;;  %s3336_s8 = sld [smem:[#allocation6 + $0x1]] }
  0x52   : > { %487 = vmatprep.subr.mxu0 %v2780_v1  ;;  %1609 = vrot.lane.b32.xlu0 %v1603_v57, %s2781_s28 }
  0x53   : > { %488 = vmatpush1.msra.mxu0 %v413_v13 }
  0x54   : > { %489 = vmatprep.subr.mxu0 %v2780_v1  ;;  %1665 = vrot.lane.b32.xlu1 %v1659_v56, %s2781_s28 }
  0x55   : > { %490 = vmatpush1.msra.mxu0 %v412_v14 }
  0x56   : > { %491 = vmatprep.subr.mxu0 %v2780_v1  ;;  %1693 = vrot.lane.b32.xlu0 %v1687_v59, %s2781_s28 }
  0x57   : > { %492 = vmatpush1.msra.mxu0 %v411_v15 }
  0x58   : > { %493 = vmatprep.subr.mxu0 %v2780_v1  ;;  %1721 = vrot.lane.b32.xlu1 %v1715_v58, %s2781_s28 }
  0x59   : > { %494 = vmatpush1.msra.mxu0 %v410_v16 }
  0x5a   : > { %495 = vmatprep.subr.mxu0 %v2780_v1  ;;  %1749 = vrot.lane.b32.xlu0 %v1743_v61, %s2781_s28 }
  0x5b   : > { %496 = vmatpush1.msra.mxu0 %v409_v17 }
  0x5c   : > { %513 = vmatprep.subr.mxu0 %v2780_v1  ;;  %1777 = vrot.lane.b32.xlu1 %v1771_v60, %s2781_s28 }
  0x5d   : > { %514 = vmatpush2.msra.mxu0 %v432_v18 }
  0x5e   : > { %515 = vmatprep.subr.mxu0 %v2780_v1  ;;  %1805 = vrot.lane.b32.xlu0 %v3137_v62, %s2781_s28 }
  0x5f   : > { %516 = vmatpush2.msra.mxu0 %v431_v19 }
  0x60   : > { %517 = vmatprep.subr.mxu0 %v2780_v1  ;;  %1833 = vrot.lane.b32.xlu1 %v1827_v63, %s2781_s28 }
  0x61   : > { %518 = vmatpush2.msra.mxu0 %v430_v20 }
  0x62   : > { %519 = vmatprep.subr.mxu0 %v2780_v1 }
  0x63   : > { %520 = vmatpush2.msra.mxu0 %v429_v21 }
  0x64   : > { %521 = vmatprep.subr.mxu0 %v2780_v1  ;;  %1889 = vrot.lane.b32.xlu1 %v1883_v0, %s2781_s28 }
  0x65   : > { %522 = vmatpush2.msra.mxu0 %v428_v22 }
  0x66   : > { %523 = vmatprep.subr.mxu0 %v2780_v1 }
  0x67   : > { %524 = vmatpush2.msra.mxu0 %v427_v23 }
  0x68   : > { %525 = vmatprep.subr.mxu0 %v2780_v1  ;;  %1945 = vrot.lane.b32.xlu1 %v1939_v2, %s2781_s28 }
  0x69   : > { %526 = vmatpush2.msra.mxu0 %v426_v24 }
  0x6a   : > { %527 = vmatprep.subr.mxu0 %v2780_v1  ;;  %v1855_v1 = vrot.slane %v3137_v62, 2 }
  0x6b   : > { %528 = vmatpush2.msra.mxu0 %v425_v25 }
  0x6c   : > { %530 = vmatmul.mubr.f32.vlgmr.msra.gmra.mxu0 %v393_v26  ;;  %2475 = vmatprep.subr.mxu0 %v3041_v42 }
  0x6d   : > { %2282 = vmatprep.mubr.msk.f32.mxu0 %vm440_vm0, %v396_v27  ;;  %2476 = vmatpush3.msra.mxu0 %v3041_v42 }
  0x6e   : > { %2477 = vmatprep.subr.mxu0 %v3048_v43  ;;  %1861 = vrot.lane.b32.xlu0 %v1855_v1, %s2781_s28 }
  0x6f   : > { %2478 = vmatpush3.msra.mxu0 %v3048_v43  ;;  %2001 = vrot.lane.b32.xlu1 %v1995_v4, %s2781_s28 }
  0x70   : > { %535 = vmatmul.mubr.f32.gmra.mxu0 %v395_v28  ;;  %2479 = vmatprep.subr.mxu0 %v3055_v44 }
  0x71   : > { %2283 = vmatprep.mubr.msk.f32.mxu0 %vm440_vm0, %v398_v29  ;;  %2480 = vmatpush3.msra.mxu0 %v3055_v44 }
  0x72   : > { %2481 = vmatprep.subr.mxu0 %v3063_v45  ;;  %1917 = vrot.lane.b32.xlu0 %v1911_v3, %s2781_s28 }
  0x73   : > { %2482 = vmatpush3.msra.mxu0 %v3063_v45 }
  0x74   : > { %540 = vmatmul.mubr.f32.gmra.mxu0 %v397_v30  ;;  %2483 = vmatprep.subr.mxu0 %v3075_v46 }
  0x75   : > { %2284 = vmatprep.mubr.msk.f32.mxu0 %vm440_vm0, %v400_v31  ;;  %2484 = vmatpush3.msra.mxu0 %v3075_v46 }
  0x76   : > { %2485 = vmatprep.subr.mxu0 %v3082_v47  ;;  %1973 = vrot.lane.b32.xlu0 %v1967_v5, %s2781_s28 }
  0x77   : > { %2486 = vmatpush3.msra.mxu0 %v3082_v47 }
  0x78   : > { %545 = vmatmul.mubr.f32.gmra.mxu0 %v399_v32 }
  0x79   : > { %2285 = vmatprep.mubr.msk.f32.mxu0 %vm440_vm0, %v402_v33 }
  0x7c   : > { %550 = vmatmul.mubr.f32.gmra.mxu0 %v401_v34  ;;  %v1202_v34 = vld [vmem:[%s3069_s18 + $0x30] sm:$0xff] }
  0x7d   : > { %2286 = vmatprep.mubr.msk.f32.mxu0 %vm440_vm0, %v404_v35 }
  0x7f   : > { %s3290_s15 = spop %2548 }
  0x80   : > { %555 = vmatmul.mubr.f32.gmra.mxu0 %v403_v36 }
  0x81   : > { %2287 = vmatprep.mubr.msk.f32.mxu0 %vm440_vm0, %v406_v37 }
  0x84   : > { %560 = vmatmul.mubr.f32.gmra.mxu0 %v405_v38 }
  0x85   : > { %2288 = vmatprep.mubr.msk.f32.mxu0 %vm440_vm0, %v408_v39 }
  0x88   : > { %565 = vmatmul.mubr.f32.gmra.mxu0 %v407_v40 }
  0x89   : > { %2487 = vmatprep.mubr.msk.f32.mxu0 %vm1241_vm2, %v1196_v48 }
  0x8c   : > { %2488 = vmatmul.mubr.msk.f32.vlgmr.msra.gmra.mxu0 %vm1241_vm2, %v1197_v49  ;;  %v1207_v49 = vld [vmem:[%s3069_s18 + $0x58] sm:$0xff] }
  0x8d   : > { %2490 = vmatprep.mubr.msk.f32.mxu0 %vm1241_vm2, %v1198_v50  ;;  %v1208_v50 = vld [vmem:[%s3069_s18 + $0x60] sm:$0xff] }
  0x90   : > { %2491 = vmatmul.mubr.msk.f32.gmra.mxu0 %vm1241_vm2, %v1199_v51 }
  0x91   : > { %2493 = vmatprep.mubr.msk.f32.mxu0 %vm1241_vm2, %v1200_v54  ;;  %v1210_v54 = vld [vmem:[%s3069_s18 + $0x70] sm:$0xff] }
  0x94   : > { %2494 = vmatmul.mubr.msk.f32.gmra.mxu0 %vm1241_vm2, %v1201_v55 }
  0xc0   : > { %v1581_v30 = vpop.permute.xlu0 %1580 }
  0xc1   : > { %2550 = vpush %v1581_v30 }
  0xc2   : > { %v1638_v32 = vpop.permute.xlu1 %1637  ;;  %2552 = vpush %v1603_v57 }
  0xc4   : > { %v1610_v35 = vpop.permute.xlu0 %1609 }
  0xc5   : > { %2554 = vpush %v1610_v35 }
  0xc6   : > { %v1666_v36 = vpop.permute.xlu1 %1665  ;;  %2556 = vpush %v1631_v53  ;;  %v1209_v53 = vld [vmem:[%s3069_s18 + $0x68] sm:$0xff] }
  0xc7   : > { %2558 = vpush %v1638_v32 }
  0xc8   : > { %v1694_v37 = vpop.permute.xlu0 %1693  ;;  %2560 = vpush %v1659_v56  ;;  %v1211_v56 = vld [vmem:[%s3069_s18 + $0x78] sm:$0xff] }
  0xc9   : > { %2562 = vpush %v1666_v36 }
  0xca   : > { %v1722_v38 = vpop.permute.xlu1 %1721  ;;  %2564 = vpush %v1687_v59  ;;  %v1213_v59 = vld [vmem:[%s3069_s18 + $0x88] sm:$0xff] }
  0xcb   : > { %2566 = vpush %v1694_v37 }
  0xcc   : > { %v1750_v39 = vpop.permute.xlu0 %1749  ;;  %2568 = vpush %v1715_v58  ;;  %v1212_v58 = vld [vmem:[%s3069_s18 + $0x80] sm:$0xff] }
  0xcd   : > { %2570 = vpush %v1722_v38 }
  0xce   : > { %v1778_v40 = vpop.permute.xlu1 %1777  ;;  %2572 = vpush %v1743_v61  ;;  %v1215_v61 = vld [vmem:[%s3069_s18 + $0x98] sm:$0xff] }
  0xcf   : > { %2574 = vpush %v1750_v39 }
  0xd0   : > { %2576 = vpush %v1771_v60  ;;  %v1214_v60 = vld [vmem:[%s3069_s18 + $0x90] sm:$0xff] }
  0xd1   : > { %2578 = vpush %v1778_v40 }
  0xd2   : > { %2580 = vpush %v3137_v62  ;;  %v1217_v62 = vld [vmem:[%s3069_s18 + $0xa8] sm:$0xff] }
  0xf2   : > { %s3292_s21 = spop %2550 }
  0xf3   : > { %s3294_s0 = spop %2552  ;;  %v1583_v32 = vstv %s3292_s21  ;;  %s1568_s21 = scalar_lea.vmem [#allocation2], %s3324_s2 }
  0xf4   : > { %s3406_s2 = sld [smem:[#allocation6 + $0x7]] }
  0xf6   : > { %s3297_s27 = spop %2554 }
  0xf7   : > { %s3300_s28 = spop %2556 }
  0xf8   : > { %v1633_v35 = vstv %s3300_s28  ;;  %s3483_s28 = sld [smem:[#allocation5 + $0xb]] }
 0x12c   : > { %v531_v7 = vpop.f32.mrf.mxu0 }
 0x12d   : > { %v532_v8 = vadd.f32 %v2280_v6, %v531_v7  ;;  %v1225_v7 = vld [vmem:[%s3069_s18 + $0xe8] sm:$0xff] }
 0x12e   : > { %v533_v9 = vpop.f32.mrf.mxu0 }
 0x12f   : > { %2435 = vmatprep.subr.mxu1 %v532_v8  ;;  %v1227_v9 = vld [vmem:[%s3069_s18 + $0xf8] sm:$0xff] }
 0x130   : > { %v536_v11 = vpop.f32.mrf.mxu0  ;;  %2436 = vmatpush3.msra.mxu1 %v532_v8  ;;  %v1226_v8 = vld [vmem:[%s3069_s18 + $0xf0] sm:$0xff] }
 0x131   : > { %v537_v12 = vadd.f32 %v2280_v6, %v536_v11  ;;  %2438 = vmatmul.mubr.msk.f32.vlgmr.msra.gmra.mxu1 %vm572_vm1, %v571_v10 }
 0x132   : > { %v538_v13 = vpop.f32.mrf.mxu0  ;;  %2442 = vmatprep.mubr.msk.f32.mxu1 %vm572_vm1, %v3034_v41 }
 0x133   : > { %2440 = vmatprep.subr.mxu1 %v537_v12 }
 0x134   : > { %v541_v14 = vpop.f32.mrf.mxu0  ;;  %2441 = vmatpush3.msra.mxu1 %v537_v12 }
 0x135   : > { %v542_v15 = vadd.f32 %v2280_v6, %v541_v14  ;;  %2443 = vmatmul.mubr.msk.f32.vlgmr.msra.gmra.mxu1 %vm572_vm1, %v571_v10 }
 0x136   : > { %v543_v16 = vpop.f32.mrf.mxu0  ;;  %2447 = vmatprep.mubr.msk.f32.mxu1 %vm572_vm1, %v3034_v41 }
 0x137   : > { %2445 = vmatprep.subr.mxu1 %v542_v15 }
 0x138   : > { %v546_v17 = vpop.f32.mrf.mxu0  ;;  %2446 = vmatpush3.msra.mxu1 %v542_v15 }
 0x139   : > { %v547_v18 = vadd.f32 %v2280_v6, %v546_v17  ;;  %2448 = vmatmul.mubr.msk.f32.vlgmr.msra.gmra.mxu1 %vm572_vm1, %v571_v10 }
 0x13a   : > { %v548_v19 = vpop.f32.mrf.mxu0  ;;  %2452 = vmatprep.mubr.msk.f32.mxu1 %vm572_vm1, %v3034_v41 }
 0x13b   : > { %2450 = vmatprep.subr.mxu1 %v547_v18 }
 0x13c   : > { %v551_v20 = vpop.f32.mrf.mxu0  ;;  %2451 = vmatpush3.msra.mxu1 %v547_v18 }
 0x13d   : > { %v552_v21 = vadd.f32 %v2280_v6, %v551_v20  ;;  %2453 = vmatmul.mubr.msk.f32.vlgmr.msra.gmra.mxu1 %vm572_vm1, %v571_v10 }
 0x13e   : > { %v553_v22 = vpop.f32.mrf.mxu0  ;;  %2457 = vmatprep.mubr.msk.f32.mxu1 %vm572_vm1, %v3034_v41 }
 0x13f   : > { %2455 = vmatprep.subr.mxu1 %v552_v21 }
 0x140   : > { %v556_v23 = vpop.f32.mrf.mxu0  ;;  %2456 = vmatpush3.msra.mxu1 %v552_v21 }
 0x141   : > { %v557_v24 = vadd.f32 %v2280_v6, %v556_v23  ;;  %2458 = vmatmul.mubr.msk.f32.vlgmr.msra.gmra.mxu1 %vm572_vm1, %v571_v10 }
 0x142   : > { %v558_v25 = vpop.f32.mrf.mxu0  ;;  %2462 = vmatprep.mubr.msk.f32.mxu1 %vm572_vm1, %v3034_v41 }
 0x143   : > { %2460 = vmatprep.subr.mxu1 %v557_v24 }
 0x144   : > { %v561_v26 = vpop.f32.mrf.mxu0  ;;  %2461 = vmatpush3.msra.mxu1 %v557_v24 }
 0x145   : > { %v562_v27 = vadd.f32 %v2280_v6, %v561_v26  ;;  %2463 = vmatmul.mubr.msk.f32.vlgmr.msra.gmra.mxu1 %vm572_vm1, %v571_v10 }
 0x146   : > { %v563_v28 = vpop.f32.mrf.mxu0  ;;  %2467 = vmatprep.mubr.msk.f32.mxu1 %vm572_vm1, %v3034_v41 }
 0x147   : > { %2465 = vmatprep.subr.mxu1 %v562_v27  ;;  %v3361_v28 = vld [vmem:[%s3877_s7] ss:$0 sm:$0xff] }
 0x148   : > { %v566_v29 = vpop.f32.mrf.mxu0  ;;  %2466 = vmatpush3.msra.mxu1 %v562_v27 }
 0x149   : > { %v567_v31 = vadd.f32 %v2280_v6, %v566_v29  ;;  %2468 = vmatmul.mubr.msk.f32.vlgmr.msra.gmra.mxu1 %vm572_vm1, %v571_v10  ;;  %v1224_v6 = vld [vmem:[%s3069_s18 + $0xe0] sm:$0xff] }
 0x14a   : > { %v568_v33 = vpop.f32.mrf.mxu0  ;;  %2472 = vmatprep.mubr.msk.f32.mxu1 %vm572_vm1, %v3034_v41  ;;  %v1203_v41 = vld [vmem:[%s3069_s18 + $0x38] sm:$0xff] }
 0x14b   : > { %2470 = vmatprep.subr.mxu1 %v567_v31  ;;  %v1605_v33 = vstv %s3294_s0  ;;  %s1571_s0 = scalar_lea.vmem [#allocation2], %s3329_s4  ;;  %s1600_s4 = scalar_lea.vmem [#allocation2], %s3336_s8 }
 0x14c   : > { %2471 = vmatpush3.msra.mxu1 %v567_v31  ;;  %v2489_v23 = vpop.f32.mrf.mxu0  ;;  %v1576_v31 = vstv %s3290_s15  ;;  %s3392_s15 = sld [smem:[#allocation6 + $0x6]] }
 0x14d   : > { %2473 = vmatmul.mubr.msk.f32.vlgmr.msra.gmra.mxu1 %vm572_vm1, %v571_v10  ;;  %2535 = vmatprep.subr.mxu1 %v3041_v42  ;;  %v3374_v30 = vadd.f32 %v2489_v23, %v3361_v28  ;;  %s3422_s8 = sld [smem:[#allocation5 + $0x9]] }
 0x14e   : > { %2541 = vmatpush3.msra.mxu1 %v3041_v42  ;;  %2496 = vmatprep.mubr.msk.f32.mxu1 %vm1241_vm2, %v1202_v34  ;;  %v1204_v42 = vld [vmem:[%s3069_s18 + $0x40] sm:$0xff]  ;;  %v1404_v26 = vpop.f32.mrf.mxu0  ;;  %v1612_v34 = vstv %s3297_s27  ;;  %s3400_s27 = sld [smem:[#allocation5 + $0x7]] }
 0x14f   : > { %2536 = vmatprep.subr.mxu1 %v3048_v43 }
 0x150   : > { %2542 = vmatpush3.msra.mxu1 %v3048_v43  ;;  %v1806_v43 = vpop.permute.xlu0 %1805  ;;  %v2492_v29 = vpop.f32.mrf.mxu0 }
 0x151   : > { %2537 = vmatprep.subr.mxu1 %v3055_v44  ;;  %2582 = vpush %v1806_v43  ;;  %v1420_v43 = vadd.f32 %v2492_v29, %v3361_v28 }
 0x152   : > { %2543 = vmatpush3.msra.mxu1 %v3055_v44  ;;  %v1834_v44 = vpop.permute.xlu1 %1833  ;;  %2584 = vpush %v1827_v63  ;;  %v1216_v63 = vld [vmem:[%s3069_s18 + $0xa0] sm:$0xff]  ;;  %v1414_v37 = vpop.f32.mrf.mxu0 }
 0x153   : > { %2538 = vmatprep.subr.mxu1 %v3063_v45  ;;  %2586 = vpush %v1834_v44  ;;  %v1415_v44 = vadd.f32 %v3361_v28, %v1414_v37 }
 0x154   : > { %2544 = vmatpush3.msra.mxu1 %v3063_v45  ;;  %v1205_v45 = vld [vmem:[%s3069_s18 + $0x48] sm:$0xff]  ;;  %v1862_v48 = vpop.permute.xlu0 %1861  ;;  %2588 = vpush %v1855_v1  ;;  %v1219_v1 = vld [vmem:[%s3069_s18 + $0xb8] sm:$0xff] }
 0x155   : > { %2539 = vmatprep.subr.mxu1 %v3075_v46  ;;  %2590 = vpush %v1862_v48 }
 0x156   : > { %2545 = vmatpush3.msra.mxu1 %v3075_v46  ;;  %v1206_v46 = vld [vmem:[%s3069_s18 + $0x50] sm:$0xff]  ;;  %2592 = vpush %v1883_v0 }
 0x157   : > { %2540 = vmatprep.subr.mxu1 %v3082_v47  ;;  %v1218_v0 = vld [vmem:[%s3069_s18 + $0xb0] sm:$0xff] }
 0x158   : > { %2546 = vmatpush3.msra.mxu1 %v3082_v47  ;;  %v1890_v47 = vpop.permute.xlu1 %1889  ;;  %v1918_v51 = vpop.permute.xlu0 %1917 }
 0x159   : > { %2497 = vmatmul.mubr.msk.f32.vlgmr.msra.gmra.mxu1 %vm1241_vm2, %v1203_v41  ;;  %2594 = vpush %v1890_v47 }
 0x15a   : > { %2499 = vmatprep.mubr.msk.f32.mxu1 %vm1241_vm2, %v1204_v42  ;;  %2596 = vpush %v1911_v3  ;;  %v1221_v3 = vld [vmem:[%s3069_s18 + $0xc8] sm:$0xff]  ;;  %v1405_v42 = vadd.f32 %v3361_v28, %v1404_v26 }
 0x15b   : > { %2598 = vpush %v1918_v51 }
 0x15c   : > { %v1946_v52 = vpop.permute.xlu1 %1945  ;;  %v1974_v55 = vpop.permute.xlu0 %1973  ;;  %2600 = vpush %v1939_v2  ;;  %v1220_v2 = vld [vmem:[%s3069_s18 + $0xc0] sm:$0xff] }
 0x15d   : > { %2500 = vmatmul.mubr.msk.f32.gmra.mxu1 %vm1241_vm2, %v1205_v45  ;;  %2602 = vpush %v1946_v52 }
 0x15e   : > { %2502 = vmatprep.mubr.msk.f32.mxu1 %vm1241_vm2, %v1206_v46  ;;  %2604 = vpush %v1967_v5  ;;  %v1223_v5 = vld [vmem:[%s3069_s18 + $0xd8] sm:$0xff] }
 0x15f   : > { %2606 = vpush %v1974_v55 }
 0x160   : > { %v2002_v57 = vpop.permute.xlu1 %2001  ;;  %2608 = vpush %v1995_v4  ;;  %v1222_v4 = vld [vmem:[%s3069_s18 + $0xd0] sm:$0xff]  ;;  %s3303_s18 = spop %2558 }
 0x161   : > { %2503 = vmatmul.mubr.msk.f32.gmra.mxu1 %vm1241_vm2, %v1207_v49  ;;  %2610 = vpush %v2002_v57  ;;  %s3306_s30 = spop %2560  ;;  %v1640_v36 = vstv %s3303_s18  ;;  %s1737_s18 = scalar_lea.vmem [#allocation2], %s3384_s11 }
 0x162   : > { %2505 = vmatprep.mubr.msk.f32.mxu1 %vm1241_vm2, %v1208_v50  ;;  %s3309_s12 = spop %2562  ;;  %v1661_v38 = vstv %s3306_s30  ;;  %s1740_s30 = scalar_lea.vmem [#allocation2], %s3392_s15 }
 0x163   : > { %s3312_s16 = spop %2564  ;;  %v1668_v39 = vstv %s3309_s12  ;;  %s1768_s15 = scalar_lea.vmem [#allocation2], %s3406_s2 }
 0x164   : > { %3865 = sst [smem:[#allocation21_spill]] %s3312_s16  ;;  %s3315_s17 = spop %2566  ;;  %v1689_v40 = vstv %s3312_s16 }
 0x165   : > { %2506 = vmatmul.mubr.msk.f32.gmra.mxu1 %vm1241_vm2, %v1209_v53  ;;  %3866 = sst [smem:[#allocation22_spill]] %s3315_s17  ;;  %s3318_s19 = spop %2568  ;;  %v1696_v41 = vstv %s3315_s17 }
 0x166   : > { %2508 = vmatprep.mubr.msk.f32.mxu1 %vm1241_vm2, %v1210_v54  ;;  %s3321_s20 = spop %2570  ;;  %v1717_v47 = vstv %s3318_s19  ;;  %s1597_s16 = scalar_lea.vmem [#allocation2], %s3331_s5 }
 0x167   : > { %3867 = sst [smem:[#allocation23_spill]] %s3321_s20  ;;  %s3326_s3 = spop %2572  ;;  %v1724_v55 = vstv %s3321_s20 }
 0x168   : > { %3868 = sst [smem:[#allocation24_spill]] %s3326_s3  ;;  %s3333_s6 = spop %2574 }
 0x169   : > { %2509 = vmatmul.mubr.msk.f32.gmra.mxu1 %vm1241_vm2, %v1211_v56  ;;  %3869 = sst [smem:[#allocation25_spill]] %s3333_s6  ;;  %s3338_s9 = spop %2576 }
 0x16a   : > { %2511 = vmatprep.mubr.msk.f32.mxu1 %vm1241_vm2, %v1212_v58  ;;  %3870 = sst [smem:[#allocation26_spill]] %s3338_s9  ;;  %s3343_s25 = spop %2578 }
 0x16b   : > { %3872 = sst [smem:[#allocation28_spill]] %s3343_s25  ;;  %s3348_s23 = spop %2580 }
 0x16c   : > { %3874 = sst [smem:[#allocation30_spill]] %s3348_s23 }
 0x16d   : > { %2512 = vmatmul.mubr.msk.f32.gmra.mxu1 %vm1241_vm2, %v1213_v59  ;;  %s3879_s5 = sld [smem:[#allocation27_spill]] }
 0x16e   : > { %2514 = vmatprep.mubr.msk.f32.mxu1 %vm1241_vm2, %v1214_v60  ;;  %s3881_s20 = sld [smem:[#allocation31_spill]] }
 0x16f   : > { %s3659_s12 = sld [smem:[#allocation5 + $0xf]] }
 0x171   : > { %2515 = vmatmul.mubr.msk.f32.gmra.mxu1 %vm1241_vm2, %v1215_v61  ;;  %v1745_v61 = vstv %s3326_s3  ;;  %s3880_s3 = sld [smem:[#allocation29_spill]] }
 0x172   : > { %2517 = vmatprep.mubr.msk.f32.mxu1 %vm1241_vm2, %v1216_v63 }
 0x175   : > { %2518 = vmatmul.mubr.msk.f32.gmra.mxu1 %vm1241_vm2, %v1217_v62 }
 0x176   : > { %2520 = vmatprep.mubr.msk.f32.mxu1 %vm1241_vm2, %v1218_v0 }
 0x179   : > { %2521 = vmatmul.mubr.msk.f32.gmra.mxu1 %vm1241_vm2, %v1219_v1 }
 0x17a   : > { %2523 = vmatprep.mubr.msk.f32.mxu1 %vm1241_vm2, %v1220_v2  ;;  %v1752_v2 = vstv %s3333_s6  ;;  %s3429_s6 = sld [smem:[#allocation6 + $0x9]] }
 0x17d   : > { %2524 = vmatmul.mubr.msk.f32.gmra.mxu1 %vm1241_vm2, %v1221_v3 }
 0x17e   : > { %2526 = vmatprep.mubr.msk.f32.mxu1 %vm1241_vm2, %v1222_v4  ;;  %v1773_v4 = vstv %s3338_s9  ;;  %s1625_s9 = scalar_lea.vmem [#allocation2], %s3879_s5  ;;  %s3445_s5 = sld [smem:[#allocation6 + $0xa]] }
 0x181   : > { %2527 = vmatmul.mubr.msk.f32.gmra.mxu1 %vm1241_vm2, %v1223_v5  ;;  %v1780_v5 = vstv %s3343_s25 }
 0x182   : > { %2529 = vmatprep.mubr.msk.f32.mxu1 %vm1241_vm2, %v1224_v6  ;;  %s3353_s1 = spop %2582  ;;  %v1801_v6 = vstv %s3348_s23  ;;  %s3435_s23 = sld [smem:[#allocation5 + $0xa]] }
 0x183   : > { %3876 = sst [smem:[#allocation32_spill]] %s3353_s1  ;;  %s3365_s22 = spop %2584 }
 0x184   : > { %s3371_s29 = spop %2586 }
 0x185   : > { %2530 = vmatmul.mubr.msk.f32.gmra.mxu1 %vm1241_vm2, %v1225_v7  ;;  %3878 = sst [smem:[#allocation33_spill]] %s3371_s29  ;;  %s3386_s7 = spop %2588 }
 0x186   : > { %2532 = vmatprep.mubr.msk.f32.mxu1 %vm1241_vm2, %v1226_v8  ;;  %s3402_s17 = spop %2590 }
 0x187   : > { %v1864_v29 = vstv %s3402_s17  ;;  %s3595_s17 = sld [smem:[#allocation5 + $0xd]] }
 0x189   : > { %2533 = vmatmul.mubr.msk.f32.gmra.mxu1 %vm1241_vm2, %v1227_v9 }
 0x18d   : > { %s1933_s11 = scalar_lea.vmem [#allocation2], %s3595_s17 }
 0x1f1   : > { %v2439_v10 = vpop.f32.mrf.mxu1 }
 0x1f2   : > { %656 = vst.msk [vmem:[#allocation2 + $0x8] sm:$0xff] %vm654_vm3, %v2439_v10 }
 0x1f3   : > { %v645_v11 = vpop.f32.mrf.mxu1 }
 0x1f4   : > { %655 = vst.msk [vmem:[#allocation2] sm:$0xff] %vm654_vm3, %v645_v11  ;;  %v1808_v11 = vstv %s3353_s1  ;;  %s1628_s1 = scalar_lea.vmem [#allocation2], %s3880_s3 }
 0x1f5   : > { %v2444_v12 = vpop.f32.mrf.mxu1 }
 0x1f6   : > { %733 = vst.msk [vmem:[#allocation2 + $0x18] sm:$0xff] %vm654_vm3, %v2444_v12 }
 0x1f7   : > { %v723_v13 = vpop.f32.mrf.mxu1 }
 0x1f8   : > { %732 = vst.msk [vmem:[#allocation2 + $0x10] sm:$0xff] %vm654_vm3, %v723_v13 }
 0x1f9   : > { %v2449_v14 = vpop.f32.mrf.mxu1 }
 0x1fa   : > { %810 = vst.msk [vmem:[#allocation2 + $0x28] sm:$0xff] %vm654_vm3, %v2449_v14 }
 0x1fb   : > { %v800_v15 = vpop.f32.mrf.mxu1 }
 0x1fc   : > { %809 = vst.msk [vmem:[#allocation2 + $0x20] sm:$0xff] %vm654_vm3, %v800_v15  ;;  %v1829_v15 = vstv %s3365_s22  ;;  %s1877_s22 = scalar_lea.vmem [#allocation2], %s3483_s28  ;;  %s3609_s28 = sld [smem:[#allocation6 + $0xd]] }
 0x1fd   : > { %v2454_v16 = vpop.f32.mrf.mxu1 }
 0x1fe   : > { %887 = vst.msk [vmem:[#allocation2 + $0x38] sm:$0xff] %vm654_vm3, %v2454_v16  ;;  %v1836_v16 = vstv %s3371_s29  ;;  %s1656_s29 = scalar_lea.vmem [#allocation2], %s3356_s26 }
 0x1ff   : > { %v877_v17 = vpop.f32.mrf.mxu1 }
 0x200   : > { %886 = vst.msk [vmem:[#allocation2 + $0x30] sm:$0xff] %vm654_vm3, %v877_v17  ;;  %v2495_v17 = vpop.f32.mrf.mxu0 }
 0x201   : > { %v2459_v18 = vpop.f32.mrf.mxu1 }
 0x202   : > { %964 = vst.msk [vmem:[#allocation2 + $0x48] sm:$0xff] %vm654_vm3, %v2459_v18 }
 0x203   : > { %v954_v19 = vpop.f32.mrf.mxu1 }
 0x204   : > { %963 = vst.msk [vmem:[#allocation2 + $0x40] sm:$0xff] %vm654_vm3, %v954_v19 }
 0x205   : > { %v2464_v20 = vpop.f32.mrf.mxu1 }
 0x206   : > { %1041 = vst.msk [vmem:[#allocation2 + $0x58] sm:$0xff] %vm654_vm3, %v2464_v20 }
 0x207   : > { %v1031_v21 = vpop.f32.mrf.mxu1 }
 0x208   : > { %1040 = vst.msk [vmem:[#allocation2 + $0x50] sm:$0xff] %vm654_vm3, %v1031_v21 }
 0x209   : > { %v2469_v22 = vpop.f32.mrf.mxu1 }
 0x20a   : > { %1118 = vst.msk [vmem:[#allocation2 + $0x68] sm:$0xff] %vm654_vm3, %v2469_v22 }
 0x20b   : > { %v1108_v24 = vpop.f32.mrf.mxu1 }
 0x20c   : > { %1117 = vst.msk [vmem:[#allocation2 + $0x60] sm:$0xff] %vm654_vm3, %v1108_v24  ;;  %v1857_v24 = vstv %s3386_s7 }
 0x20d   : > { %v2474_v25 = vpop.f32.mrf.mxu1 }
 0x20e   : > { %1195 = vst.msk [vmem:[#allocation2 + $0x78] sm:$0xff] %vm654_vm3, %v2474_v25 }
 0x20f   : > { %v1185_v27 = vpop.f32.mrf.mxu1 }
 0x210   : > { %1194 = vst.msk [vmem:[#allocation2 + $0x70] sm:$0xff] %vm654_vm3, %v1185_v27 }
 0x217   : > { %v1569_v45 = vld [vmem:[%s1568_s21] sm:$0xff]  ;;  %v1570_v46 = vld [vmem:[%s1568_s21 + $0x8] sm:$0xff]  ;;  %s3410_s21 = sld [smem:[#allocation5 + $0x8]] }
 0x218   : > { %v1572_v48 = vld [vmem:[%s1571_s0] sm:$0xff]  ;;  %v1578_v49 = vmul.f32 %v1576_v31, %v1569_v45  ;;  %v1579_v50 = vmul.f32 %v1576_v31, %v1570_v46  ;;  %v1573_v51 = vld [vmem:[%s1571_s0 + $0x8] sm:$0xff]  ;;  %s3412_s0 = spop %2592 }
 0x219   : > { %v1585_v52 = vmul.f32 %v1583_v32, %v1572_v48  ;;  %v1598_v53 = vld [vmem:[%s1597_s16] sm:$0xff]  ;;  %v1599_v54 = vld [vmem:[%s1597_s16 + $0x8] sm:$0xff]  ;;  %v1586_v56 = vmul.f32 %v1583_v32, %v1573_v51  ;;  %v3414_v63 = vpop.f32.mrf.mxu1  ;;  %s3417_s16 = sld [smem:[#allocation6 + $0x8]]  ;;  %v1885_v32 = vstv %s3412_s0 }
 0x21a   : > { %v1607_v57 = vmul.f32 %v1605_v33, %v1598_v53  ;;  %v1608_v58 = vmul.f32 %v1605_v33, %v1599_v54  ;;  %v1601_v59 = vld [vmem:[%s1600_s4] sm:$0xff]  ;;  %v1602_v60 = vld [vmem:[%s1600_s4 + $0x8] sm:$0xff]  ;;  %s3424_s4 = spop %2594  ;;  %s3629_s0 = sld [smem:[#allocation5 + $0xe]] }
 0x21b   : > { %v1587_v62 = vadd.f32 %v1585_v52, %v1578_v49  ;;  %v1614_v0 = vmul.f32 %v1612_v34, %v1601_v59  ;;  %v1615_v1 = vmul.f32 %v1612_v34, %v1602_v60  ;;  %v1588_v3 = vadd.f32 %v1586_v56, %v1579_v50  ;;  %v3426_v7 = vpop.f32.mrf.mxu1  ;;  %v1626_v13 = vld [vmem:[%s1625_s9] sm:$0xff]  ;;  %v1627_v14 = vld [vmem:[%s1625_s9 + $0x8] sm:$0xff]  ;;  %s3437_s25 = spop %2596  ;;  %s1653_s9 = scalar_lea.vmem [#allocation2], %s3881_s20  ;;  %v1424_v49 = vpop.f32.mrf.mxu0 }
 0x21c   : > { %v1629_v21 = vld [vmem:[%s1628_s1] sm:$0xff]  ;;  %v1630_v22 = vld [vmem:[%s1628_s1 + $0x8] sm:$0xff]  ;;  %s3450_s3 = spop %2598  ;;  %s1681_s1 = scalar_lea.vmem [#allocation2], %s3363_s24  ;;  %v1892_v33 = vstv %s3424_s4  ;;  %v1913_v34 = vstv %s3437_s25  ;;  %v1635_v37 = vmul.f32 %v1633_v35, %v1626_v13 }
 0x21d   : > { %v1589_v8 = vadd.f32 %v1587_v62, %v1405_v42  ;;  %v1616_v9 = vadd.f32 %v1614_v0, %v1607_v57  ;;  %v1617_v10 = vadd.f32 %v1615_v1, %v1608_v58  ;;  %v1590_v12 = vadd.f32 %v1588_v3, %v3374_v30  ;;  %v3439_v18 = vpop.f32.mrf.mxu1  ;;  %v1654_v23 = vld [vmem:[%s1653_s9] sm:$0xff]  ;;  %v1655_v25 = vld [vmem:[%s1653_s9 + $0x8] sm:$0xff]  ;;  %s1684_s24 = scalar_lea.vmem [#allocation2], %s3367_s13  ;;  %s3469_s26 = spop %2600 }
 0x21e   : > { %v1657_v26 = vld [vmem:[%s1656_s29] sm:$0xff]  ;;  %v1658_v27 = vld [vmem:[%s1656_s29 + $0x8] sm:$0xff]  ;;  %v1636_v42 = vmul.f32 %v1633_v35, %v1627_v14  ;;  %v1663_v51 = vmul.f32 %v1661_v38, %v1654_v23  ;;  %v1664_v35 = vmul.f32 %v1661_v38, %v1655_v25  ;;  %s1709_s29 = scalar_lea.vmem [#allocation2], %s3369_s14  ;;  %s1712_s13 = scalar_lea.vmem [#allocation2], %s3378_s10  ;;  %v1920_v38 = vstv %s3450_s3 }
 0x21f   : > { %1592 = vst.msk [vmem:[#allocation3] sm:$0xff] %vm654_vm3, %v1589_v8  ;;  %v1618_v19 = vadd.f32 %v1616_v9, %v1415_v44  ;;  %v1619_v20 = vadd.f32 %v1617_v10, %v1420_v43  ;;  %1593 = vst.msk [vmem:[#allocation3 + $0x8] sm:$0xff] %vm654_vm3, %v1590_v12  ;;  %v3452_v30 = vpop.f32.mrf.mxu1  ;;  %v1682_v31 = vld [vmem:[%s1681_s1] sm:$0xff]  ;;  %v1642_v43 = vmul.f32 %v1640_v36, %v1629_v21  ;;  %v1683_v45 = vld [vmem:[%s1681_s1 + $0x8] sm:$0xff]  ;;  %s1765_s14 = scalar_lea.vmem [#allocation2], %s3400_s27  ;;  %s3491_s10 = sld [smem:[#allocation6 + $0xb]] }
 0x220   : > { %v1643_v44 = vmul.f32 %v1640_v36, %v1630_v22  ;;  %v1685_v46 = vld [vmem:[%s1684_s24] sm:$0xff]  ;;  %v1686_v48 = vld [vmem:[%s1684_s24 + $0x8] sm:$0xff]  ;;  %v1670_v52 = vmul.f32 %v1668_v39, %v1657_v26  ;;  %v1671_v36 = vmul.f32 %v1668_v39, %v1658_v27  ;;  %v3495_v3 = vadd.f32 %v2495_v17, %v3361_v28  ;;  %s1793_s9 = scalar_lea.vmem [#allocation2], %s3410_s21  ;;  %s1796_s2 = scalar_lea.vmem [#allocation2], %s3417_s16 }
 0x221   : > { %1620 = vst.msk [vmem:[#allocation3 + $0x10] sm:$0xff] %vm654_vm3, %v1618_v19  ;;  %1621 = vst.msk [vmem:[#allocation3 + $0x18] sm:$0xff] %vm654_vm3, %v1619_v20  ;;  %v3471_v50 = vpop.f32.mrf.mxu1  ;;  %v1710_v53 = vld [vmem:[%s1709_s29] sm:$0xff]  ;;  %v1711_v54 = vld [vmem:[%s1709_s29 + $0x8] sm:$0xff]  ;;  %v3498_v8 = vadd.f32 %v3361_v28, %v1424_v49  ;;  %v3500_v9 = vadd.f32 %v1642_v43, %v1635_v37  ;;  %v1691_v12 = vmul.f32 %v1689_v40, %v1682_v31  ;;  %s1821_s29 = scalar_lea.vmem [#allocation2], %s3422_s8  ;;  %s1824_s16 = scalar_lea.vmem [#allocation2], %s3429_s6 }
 0x222   : > { %v1713_v56 = vld [vmem:[%s1712_s13] sm:$0xff]  ;;  %v1714_v57 = vld [vmem:[%s1712_s13 + $0x8] sm:$0xff]  ;;  %v3502_v10 = vadd.f32 %v1643_v44, %v1636_v42  ;;  %v1692_v13 = vmul.f32 %v1689_v40, %v1683_v45  ;;  %v3511_v21 = vadd.f32 %v1670_v52, %v1663_v51  ;;  %v3513_v22 = vadd.f32 %v1671_v36, %v1664_v35  ;;  %s1849_s8 = scalar_lea.vmem [#allocation2], %s3435_s23  ;;  %s1852_s6 = scalar_lea.vmem [#allocation2], %s3445_s5 }
 0x223   : > { %v1738_v58 = vld [vmem:[%s1737_s18] sm:$0xff]  ;;  %v1739_v59 = vld [vmem:[%s1737_s18 + $0x8] sm:$0xff]  ;;  %v3487_v60 = vpop.f32.mrf.mxu1  ;;  %v1698_v23 = vmul.f32 %v1696_v41, %v1685_v46  ;;  %v1699_v25 = vmul.f32 %v1696_v41, %v1686_v48  ;;  %v1719_v31 = vmul.f32 %v1717_v47, %v1710_v53  ;;  %v1720_v37 = vmul.f32 %v1717_v47, %v1711_v54  ;;  %s3561_s23 = sld [smem:[#allocation5 + $0xc]]  ;;  %s1936_s27 = scalar_lea.vmem [#allocation2], %s3609_s28 }
 0x224   : > { %v1741_v39 = vld [vmem:[%s1740_s30] sm:$0xff]  ;;  %v1742_v62 = vld [vmem:[%s1740_s30 + $0x8] sm:$0xff]  ;;  %v1726_v42 = vmul.f32 %v1724_v55, %v1713_v56  ;;  %v1727_v43 = vmul.f32 %v1724_v55, %v1714_v57  ;;  %v1747_v48 = vmul.f32 %v1745_v61, %v1738_v58  ;;  %v1748_v49 = vmul.f32 %v1745_v61, %v1739_v59  ;;  %s3571_s5 = sld [smem:[#allocation6 + $0xc]]  ;;  %s1961_s25 = scalar_lea.vmem [#allocation2], %s3629_s0 }
 0x225   : > { %v1766_v0 = vld [vmem:[%s1765_s14] sm:$0xff]  ;;  %v1767_v14 = vld [vmem:[%s1765_s14 + $0x8] sm:$0xff]  ;;  %v3509_v20 = vpop.f32.mrf.mxu1  ;;  %v1754_v47 = vmul.f32 %v1752_v2, %v1741_v39  ;;  %v1755_v51 = vmul.f32 %v1752_v2, %v1742_v62  ;;  %s1880_s7 = scalar_lea.vmem [#allocation2], %s3491_s10  ;;  %s3639_s4 = sld [smem:[#allocation6 + $0xe]] }
 0x226   : > { %v1769_v17 = vld [vmem:[%s1768_s15] sm:$0xff]  ;;  %v1770_v19 = vld [vmem:[%s1768_s15 + $0x8] sm:$0xff]  ;;  %v1775_v36 = vmul.f32 %v1773_v4, %v1766_v0  ;;  %v1776_v61 = vmul.f32 %v1773_v4, %v1767_v14  ;;  %s3653_s14 = spop %2602  ;;  %s3666_s10 = sld [smem:[#allocation6 + $0xf]] }
 0x227   : > { %v1794_v40 = vld [vmem:[%s1793_s9] sm:$0xff]  ;;  %v1795_v26 = vld [vmem:[%s1793_s9 + $0x8] sm:$0xff]  ;;  %v3530_v46 = vpop.f32.mrf.mxu1  ;;  %v1782_v53 = vmul.f32 %v1780_v5, %v1769_v17  ;;  %v1783_v2 = vmul.f32 %v1780_v5, %v1770_v19  ;;  %v1756_v1 = vadd.f32 %v1754_v47, %v1747_v48  ;;  %v1647_v47 = vadd.f32 %v3502_v10, %v3495_v3  ;;  %s3684_s15 = spop %2604  ;;  %s3894_s21 = sld [smem:[#allocation12_spill]] }
 0x228   : > { %v1797_v27 = vld [vmem:[%s1796_s2] sm:$0xff]  ;;  %v1798_v41 = vld [vmem:[%s1796_s2 + $0x8] sm:$0xff]  ;;  %v1803_v59 = vmul.f32 %v1801_v6, %v1794_v40  ;;  %v1804_v39 = vmul.f32 %v1801_v6, %v1795_v26  ;;  %v1445_v3 = vadd.f32 %v3361_v28, %v3452_v30  ;;  %v1470_v10 = vadd.f32 %v3509_v20, %v3361_v28  ;;  %s3701_s9 = spop %2606 }
 0x229   : > { %v1822_v44 = vld [vmem:[%s1821_s29] sm:$0xff]  ;;  %v1823_v45 = vld [vmem:[%s1821_s29 + $0x8] sm:$0xff]  ;;  %v3551_v58 = vpop.f32.mrf.mxu1  ;;  %v1810_v4 = vmul.f32 %v1808_v11, %v1797_v27  ;;  %v1811_v62 = vmul.f32 %v1808_v11, %v1798_v41  ;;  %v1700_v41 = vadd.f32 %v1698_v23, %v1691_v12  ;;  %1649 = vst.msk [vmem:[#allocation3 + $0x28] sm:$0xff] %vm654_vm3, %v1647_v47  ;;  %s1905_s20 = scalar_lea.vmem [#allocation2], %s3561_s23  ;;  %s3710_s3 = spop %2608 }
 0x22a   : > { %v1825_v55 = vld [vmem:[%s1824_s16] sm:$0xff]  ;;  %v1826_v35 = vld [vmem:[%s1824_s16 + $0x8] sm:$0xff]  ;;  %v1831_v5 = vmul.f32 %v1829_v15, %v1822_v44  ;;  %v1832_v0 = vmul.f32 %v1829_v15, %v1823_v45  ;;  %v1701_v44 = vadd.f32 %v1699_v25, %v1692_v13  ;;  %v1728_v15 = vadd.f32 %v1726_v42, %v1719_v31  ;;  %s1908_s30 = scalar_lea.vmem [#allocation2], %s3571_s5  ;;  %s3718_s2 = spop %2610 }
 0x22b   : > { %v1850_v52 = vld [vmem:[%s1849_s8] sm:$0xff]  ;;  %v1851_v54 = vld [vmem:[%s1849_s8 + $0x8] sm:$0xff]  ;;  %v1838_v14 = vmul.f32 %v1836_v16, %v1825_v55  ;;  %v1839_v17 = vmul.f32 %v1836_v16, %v1826_v35  ;;  %v3573_v19 = vpop.f32.mrf.mxu1  ;;  %v1729_v45 = vadd.f32 %v1727_v43, %v1720_v37  ;;  %s1964_s1 = scalar_lea.vmem [#allocation2], %s3639_s4  ;;  %s3895_s29 = sld [smem:[#allocation14_spill]] }
 0x22c   : > { %v1853_v56 = vld [vmem:[%s1852_s6] sm:$0xff]  ;;  %v1854_v57 = vld [vmem:[%s1852_s6 + $0x8] sm:$0xff]  ;;  %v1859_v6 = vmul.f32 %v1857_v24, %v1850_v52  ;;  %v1860_v40 = vmul.f32 %v1857_v24, %v1851_v54  ;;  %v1757_v52 = vadd.f32 %v1755_v51, %v1748_v49  ;;  %v3584_v24 = vadd.f32 %v1782_v53, %v1775_v36  ;;  %s1992_s24 = scalar_lea.vmem [#allocation2], %s3666_s10  ;;  %s2782_s4 = smov [#allocation7]  }
 0x22d   : > { %v1866_v11 = vmul.f32 %v1864_v29, %v1853_v56  ;;  %v1867_v26 = vmul.f32 %v1864_v29, %v1854_v57  ;;  %v2014_v27 = vld [vmem:[#allocation3] sm:$0xff]  ;;  %v1879_v55 = vld [vmem:[%s1877_s22 + $0x8] sm:$0xff]  ;;  %v2513_v35 = vpop.f32.mrf.mxu1  ;;  %v1785_v54 = vadd.f32 %v1783_v2, %v1776_v61  ;;  %v3586_v56 = vadd.f32 %v1810_v4, %v1803_v59  ;;  %s364_s19 = sand.u32 1, %s3894_s21  }
 0x22e   : > { %v1878_v16 = vld [vmem:[%s1877_s22] sm:$0xff]  ;;  %2046 = vxpose.xlu0.b32.start [1/16] (narrow) %v2014_v27, 24  ;;  %v3588_v29 = vadd.f32 %v1811_v62, %v1804_v39  ;;  %v3590_v12 = vadd.f32 %v1838_v14, %v1831_v5  ;;  %v3592_v13 = vadd.f32 %v1839_v17, %v1832_v0  ;;  %v1882_v25 = vld [vmem:[%s1880_s7 + $0x8] sm:$0xff]  ;;  %v3607_v48 = vmul.f32 %v1885_v32, %v1879_v55  ;;  %v2017_v27 = vld [vmem:[#allocation3 + $0x18] sm:$0xff]  ;;  %s2547_s16 = smul.u32 48, %s364_s19  ;;  %s3897_s22 = sld [smem:[#allocation42_spill]] }
 0x22f   : > { %v1881_v23 = vld [vmem:[%s1880_s7] sm:$0xff]  ;;  %v1484_v31 = vpop.f32.mrf.mxu1  ;;  %v3597_v37 = vadd.f32 %v1866_v11, %v1859_v6  ;;  %v3599_v42 = vadd.f32 %v1867_v26, %v1860_v40  ;;  %v3603_v43 = vmul.f32 %v1885_v32, %v1878_v16  ;;  %v2015_v49 = vld [vmem:[#allocation3 + $0x8] sm:$0xff]  ;;  %v1646_v51 = vadd.f32 %v3500_v9, %v3498_v8  ;;  %s3749_s28 = scalar_lea.sflag [#allocation8], %s364_s19 }
 0x230   : > { %v1440_v36 = vadd.f32 %v3414_v63, %v3361_v28  ;;  %v1435_v61 = vadd.f32 %v3361_v28, %v3426_v7  ;;  %v3621_v32 = vmul.f32 %v1892_v33, %v1881_v23  ;;  %v1895_v2 = vmul.f32 %v1892_v33, %v1882_v25  ;;  %v1907_v20 = vld [vmem:[%s1905_s20 + $0x8] sm:$0xff]  ;;  %v1906_v40 = vld [vmem:[%s1905_s20] sm:$0xff]  ;;  %s366_s13 = scalar_lea.vmem [#allocation7], %s2547_s16  ;;  %s2702_s20 = sshll.u32 %s2782_s4, 4  ;;  %s2703_s20 = int_to_ptr.vmem [resolvable:$false] %s2702_s20 }
 0x231   : > { %v2516_v53 = vpop.f32.mrf.mxu1  ;;  %v1450_v57 = vadd.f32 %v3439_v18, %v3361_v28  ;;  %1648 = vst.msk [vmem:[#allocation3 + $0x20] sm:$0xff] %vm654_vm3, %v1646_v51  ;;  %v1460_v8 = vadd.f32 %v3471_v50, %v3361_v28  ;;  %v1455_v33 = vadd.f32 %v3361_v28, %v3487_v60  ;;  %v1702_v9 = vadd.f32 %v1700_v41, %v1445_v3  ;;  %v1910_v62 = vld [vmem:[%s1908_s30 + $0x8] sm:$0xff]  ;;  %s2132_s18 = sshll.u32 %s366_s13, 4  ;;  %s2612_s6 = smul.u32 768, %s3895_s29  ;;  %s3742_s18 = int_to_ptr.vmem [resolvable:$true] %s2132_s18 }
 0x232   : > { %2047 = vxpose.xlu0.b32.cont [2/16] (narrow) %v2015_v49, 24  ;;  %v1675_v63 = vadd.f32 %v3513_v22, %v1440_v36  ;;  %v1674_v7 = vadd.f32 %v3511_v21, %v1435_v61  ;;  %v1465_v22 = vadd.f32 %v3361_v28, %v3530_v46  ;;  %v2016_v21 = vld [vmem:[#allocation3 + $0x10] sm:$0xff]  ;;  %v1480_v59 = vadd.f32 %v3551_v58, %v3361_v28  ;;  %v1938_v23 = vld [vmem:[%s1936_s27 + $0x8] sm:$0xff]  ;;  %s2698_s0 = scalar_lea.vmem %s3742_s18, 768  ;;  %p2705_p11 = scmp.lt.s32.totalorder %s3742_s18, %s2703_s20 }
 0x233   : > { %v1494_v18 = vpop.f32.mrf.mxu1  ;;  %v1703_v30 = vadd.f32 %v1701_v44, %v1450_v57  ;;  %v1731_v50 = vadd.f32 %v1729_v45, %v1460_v8  ;;  %v1730_v60 = vadd.f32 %v1728_v15, %v1455_v33  ;;  %v1475_v39 = vadd.f32 %v3361_v28, %v3573_v19  ;;  %1704 = vst.msk [vmem:[#allocation3 + $0x40] sm:$0xff] %vm654_vm3, %v1702_v9  ;;  %v1909_v45 = vld [vmem:[%s1908_s30] sm:$0xff]  ;;  %v1966_v8 = vld [vmem:[%s1964_s1 + $0x8] sm:$0xff]  ;;  %p2699_p8 = scmp.ne.s32.totalorder %s3742_s18, %s2698_s0  ;;  %s2704_s30 = scalar_lea.vmem %s2703_s20, 1536 }
 0x234   : > { %1677 = vst.msk [vmem:[#allocation3 + $0x38] sm:$0xff] %vm654_vm3, %v1675_v63  ;;  %1676 = vst.msk [vmem:[#allocation3 + $0x30] sm:$0xff] %vm654_vm3, %v1674_v7  ;;  %v1759_v46 = vadd.f32 %v1757_v52, %v1470_v10  ;;  %v1758_v5 = vadd.f32 %v1756_v1, %v1465_v22  ;;  %v1490_v0 = vadd.f32 %v2513_v35, %v3361_v28  ;;  %v1948_v25 = vstv %s3653_s14  ;;  %v1962_v10 = vld [vmem:[%s1961_s25] sm:$0xff]  ;;  %v2019_v22 = vld [vmem:[#allocation3 + $0x28] sm:$0xff]  ;;  %s3898_s7 = smov %s3897_s22  ;;  %s3747_s17 = scalar_lea.hbm %s3897_s22, %s2612_s6 }
 0x235   : > { %v2519_v4 = vpop.f32.mrf.mxu1  ;;  %1705 = vst.msk [vmem:[#allocation3 + $0x48] sm:$0xff] %vm654_vm3, %v1703_v30  ;;  %v1485_v58 = vadd.f32 %v3361_v28, %v1484_v31  ;;  %1733 = vst.msk [vmem:[#allocation3 + $0x58] sm:$0xff] %vm654_vm3, %v1731_v50  ;;  %v1787_v14 = vadd.f32 %v1785_v54, %v1480_v59  ;;  %v1786_v17 = vadd.f32 %v3584_v24, %v1475_v39  ;;  %v1935_v54 = vld [vmem:[%s1933_s11 + $0x8] sm:$0xff]  ;;  %v3892_v51 = vstv %s3469_s26  ;;  %v1965_v59 = vld [vmem:[%s1964_s1] sm:$0xff]  ;;  %s1989_s26 = scalar_lea.vmem [#allocation2], %s3659_s12  ;;  %p2700_p9 = pnand %p2699_p8, %p2886_p0 }
 0x236   : > { %2048 = vxpose.xlu0.b32.cont [3/16] (narrow) %v2016_v21, 24  ;;  %1732 = vst.msk [vmem:[#allocation3 + $0x50] sm:$0xff] %vm654_vm3, %v1730_v60  ;;  %v1500_v19 = vadd.f32 %v2516_v53, %v3361_v28  ;;  %v1495_v6 = vadd.f32 %v3361_v28, %v1494_v18  ;;  %1761 = vst.msk [vmem:[#allocation3 + $0x68] sm:$0xff] %vm654_vm3, %v1759_v46  ;;  %v1815_v11 = vadd.f32 %v3588_v29, %v1490_v0  ;;  %p2706_p12 = scmp.lt.s32.totalorder %s2704_s30, %s2698_s0 }
 0x237   : > { %v1504_v1 = vpop.f32.mrf.mxu1  ;;  %1760 = vst.msk [vmem:[#allocation3 + $0x60] sm:$0xff] %vm654_vm3, %v1758_v5  ;;  %v1814_v26 = vadd.f32 %v3586_v56, %v1485_v58  ;;  %v1510_v41 = vadd.f32 %v2519_v4, %v3361_v28  ;;  %v1916_v15 = vmul.f32 %v1913_v34, %v1907_v20  ;;  %v1923_v16 = vmul.f32 %v1920_v38, %v1910_v62  ;;  %v1991_v5 = vld [vmem:[%s1989_s26 + $0x8] sm:$0xff]  ;;  %p2701_p10 = pneg %p2700_p9 }
 0x238   : > { %v1505_v44 = vadd.f32 %v3361_v28, %v1504_v1  ;;  %1789 = vst.msk [vmem:[#allocation3 + $0x78] sm:$0xff] %vm654_vm3, %v1787_v14  ;;  %1788 = vst.msk [vmem:[#allocation3 + $0x70] sm:$0xff] %vm654_vm3, %v1786_v17  ;;  %v1843_v55 = vadd.f32 %v3592_v13, %v1500_v19  ;;  %v1842_v35 = vadd.f32 %v3590_v12, %v1495_v6  ;;  %v1969_v61 = vstv %s3684_s15  ;;  %v1994_v17 = vld [vmem:[%s1992_s24 + $0x8] sm:$0xff]  ;;  %p2707_p13 = por %p2706_p12, %p2705_p11 }
 0x239   : > { %v2522_v52 = vpop.f32.mrf.mxu1  ;;  %v1897_v24 = vadd.f32 %v1895_v2, %v3607_v48  ;;  %1817 = vst.msk [vmem:[#allocation3 + $0x88] sm:$0xff] %vm654_vm3, %v1815_v11  ;;  %1816 = vst.msk [vmem:[#allocation3 + $0x80] sm:$0xff] %vm654_vm3, %v1814_v26  ;;  %v1871_v56 = vadd.f32 %v3599_v42, %v1510_v41  ;;  %v1915_v12 = vmul.f32 %v1913_v34, %v1906_v40  ;;  %v1934_v42 = vld [vmem:[%s1933_s11] sm:$0xff]  ;;  %v1963_v2 = vld [vmem:[%s1961_s25 + $0x8] sm:$0xff]  ;;  %v3893_v63 = vmov %v3892_v51 }
 0x23a   : > { %2049 = vxpose.xlu0.b32.cont [4/16] (narrow) %v2017_v27, 24  ;;  %v1870_v29 = vadd.f32 %v3597_v37, %v1505_v44  ;;  %v1520_v13 = vadd.f32 %v2522_v52, %v3361_v28  ;;  %1845 = vst.msk [vmem:[#allocation3 + $0x98] sm:$0xff] %vm654_vm3, %v1843_v55  ;;  %1844 = vst.msk [vmem:[#allocation3 + $0x90] sm:$0xff] %vm654_vm3, %v1842_v35  ;;  %v1896_v48 = vadd.f32 %v3621_v32, %v3603_v43  ;;  %v2018_v34 = vld [vmem:[#allocation3 + $0x20] sm:$0xff]  ;;  %p2708_p1 = pnand %p2707_p13, %p2701_p10 }
 0x23b   : > { %v1514_v31 = vpop.f32.mrf.mxu1  ;;  %v1922_v37 = vmul.f32 %v1920_v38, %v1909_v45  ;;  %1873 = vst.msk [vmem:[#allocation3 + $0xa8] sm:$0xff] %vm654_vm3, %v1871_v56  ;;  %v1944_v36 = vmul.f32 %v3892_v51, %v1935_v54  ;;  %v1937_v43 = vld [vmem:[%s1936_s27] sm:$0xff]  ;;  %v1925_v53 = vadd.f32 %v1923_v16, %v1916_v15  ;;  %v1951_v32 = vmul.f32 %v1948_v25, %v1938_v23  ;;  %v2020_v26 = vld [vmem:[#allocation3 + $0x30] sm:$0xff] }
 0x23c   : > { %1872 = vst.msk [vmem:[#allocation3 + $0xa0] sm:$0xff] %vm654_vm3, %v1870_v29  ;;  %v1899_v49 = vadd.f32 %v1897_v24, %v1520_v13  ;;  %v1515_v47 = vadd.f32 %v3361_v28, %v1514_v31  ;;  %v1943_v7 = vmul.f32 %v3893_v63, %v1934_v42  ;;  %v1976_v33 = vstv %s3701_s9  ;;  %v1990_v11 = vld [vmem:[%s1989_s26] sm:$0xff] }
 0x23d   : > { %v2525_v38 = vpop.f32.mrf.mxu1  ;;  %v1924_v30 = vadd.f32 %v1922_v37, %v1915_v12  ;;  %v1950_v9 = vmul.f32 %v1948_v25, %v1937_v43  ;;  %v1972_v60 = vmul.f32 %v1969_v61, %v1963_v2  ;;  %v1997_v39 = vstv %s3710_s3  ;;  %v1993_v15 = vld [vmem:[%s1992_s24] sm:$0xff]  ;;  %v2021_v12 = vld [vmem:[#allocation3 + $0x38] sm:$0xff]  ;;  %v2024_v2 = vld [vmem:[#allocation3 + $0x50] sm:$0xff] }
 0x23e   : > { %2050 = vxpose.xlu0.b32.cont [5/16] (narrow) %v2018_v34, 24  ;;  %1901 = vst.msk [vmem:[#allocation3 + $0xb8] sm:$0xff] %vm654_vm3, %v1899_v49  ;;  %v1898_v57 = vadd.f32 %v1896_v48, %v1515_v47  ;;  %v1530_v3 = vadd.f32 %v2525_v38, %v3361_v28  ;;  %v1953_v62 = vadd.f32 %v1951_v32, %v1944_v36  ;;  %v2004_v19 = vstv %s3718_s2  ;;  %v2022_v51 = vld [vmem:[#allocation3 + $0x40] sm:$0xff] }
 0x23f   : > { %v1524_v18 = vpop.f32.mrf.mxu1  ;;  %v1979_v46 = vmul.f32 %v1976_v33, %v1966_v8  ;;  %v1971_v14 = vmul.f32 %v1969_v61, %v1962_v10  ;;  %v1952_v1 = vadd.f32 %v1950_v9, %v1943_v7  ;;  %v1978_v40 = vmul.f32 %v1976_v33, %v1965_v59  ;;  %v2027_v8 = vld [vmem:[#allocation3 + $0x68] sm:$0xff]  ;;  %v2029_v9 = vld [vmem:[#allocation3 + $0x78] sm:$0xff] }
 0x240   : > { %1900 = vst.msk [vmem:[#allocation3 + $0xb0] sm:$0xff] %vm654_vm3, %v1898_v57  ;;  %v1927_v21 = vadd.f32 %v1925_v53, %v1530_v3  ;;  %v1525_v50 = vadd.f32 %v3361_v28, %v1524_v18  ;;  %v2030_v4 = vld [vmem:[#allocation3 + $0x80] sm:$0xff]  ;;  %v2000_v44 = vmul.f32 %v1997_v39, %v1991_v5  ;;  %v2031_v45 = vld [vmem:[#allocation3 + $0x88] sm:$0xff]  ;;  %v2007_v35 = vmul.f32 %v2004_v19, %v1994_v17  ;;  %v2025_v3 = vld [vmem:[#allocation3 + $0x58] sm:$0xff] }
 0x241   : > { %v2528_v20 = vpop.f32.mrf.mxu1  ;;  %2078 = vxpose.xlu1.b32.start [1/16] (narrow) %v2030_v4, 24  ;;  %v1981_v55 = vadd.f32 %v1979_v46, %v1972_v60  ;;  %v1999_v54 = vmul.f32 %v1997_v39, %v1990_v11  ;;  %v1980_v29 = vadd.f32 %v1978_v40, %v1971_v14  ;;  %v2006_v13 = vmul.f32 %v2004_v19, %v1993_v15  ;;  %v2032_v31 = vld [vmem:[#allocation3 + $0x90] sm:$0xff]  ;;  %v2033_v61 = vld [vmem:[#allocation3 + $0x98] sm:$0xff]  ;;  %v2023_v53 = vld [vmem:[#allocation3 + $0x48] sm:$0xff] }
 0x242   : > { %2051 = vxpose.xlu0.b32.cont [6/16] (narrow) %v2019_v22, 24  ;;  %1929 = vst.msk [vmem:[#allocation3 + $0xc8] sm:$0xff] %vm654_vm3, %v1927_v21  ;;  %v1926_v0 = vadd.f32 %v1924_v30, %v1525_v50  ;;  %v1540_v58 = vadd.f32 %v2528_v20, %v3361_v28  ;;  %v2009_v37 = vadd.f32 %v2007_v35, %v2000_v44  ;;  %v2035_v57 = vld [vmem:[#allocation3 + $0xa8] sm:$0xff]  ;;  %v2028_v18 = vld [vmem:[#allocation3 + $0x70] sm:$0xff] }
 0x243   : > { %v1534_v6 = vpop.f32.mrf.mxu1  ;;  %v2008_v47 = vadd.f32 %v2006_v13, %v1999_v54  ;;  %v2034_v32 = vld [vmem:[#allocation3 + $0xa0] sm:$0xff] }
 0x244   : > { %1928 = vst.msk [vmem:[#allocation3 + $0xc0] sm:$0xff] %vm654_vm3, %v1926_v0  ;;  %v1955_v27 = vadd.f32 %v1953_v62, %v1540_v58  ;;  %v1535_v41 = vadd.f32 %v3361_v28, %v1534_v6 }
 0x245   : > { %v2531_v16 = vpop.f32.mrf.mxu1  ;;  %2079 = vxpose.xlu1.b32.cont [2/16] (narrow) %v2031_v45, 24  ;;  %v2037_v7 = vld [vmem:[#allocation3 + $0xb8] sm:$0xff] }
 0x246   : > { %2052 = vxpose.xlu0.b32.cont [7/16] (narrow) %v2020_v26, 24  ;;  %1957 = vst.msk [vmem:[#allocation3 + $0xd8] sm:$0xff] %vm654_vm3, %v1955_v27  ;;  %v1954_v52 = vadd.f32 %v1952_v1, %v1535_v41  ;;  %v1550_v24 = vadd.f32 %v2531_v16, %v3361_v28 }
 0x247   : > { %v1544_v56 = vpop.f32.mrf.mxu1  ;;  %v2036_v63 = vld [vmem:[#allocation3 + $0xb0] sm:$0xff] }
 0x248   : > { %1956 = vst.msk [vmem:[#allocation3 + $0xd0] sm:$0xff] %vm654_vm3, %v1954_v52  ;;  %v1983_v23 = vadd.f32 %v1981_v55, %v1550_v24  ;;  %v1545_v25 = vadd.f32 %v3361_v28, %v1544_v56 }
 0x249   : > { %v2534_v48 = vpop.f32.mrf.mxu1  ;;  %2080 = vxpose.xlu1.b32.cont [3/16] (narrow) %v2032_v31, 24  ;;  %v2039_v30 = vld [vmem:[#allocation3 + $0xc8] sm:$0xff] }
 0x24a   : > { %2053 = vxpose.xlu0.b32.cont [8/16] (narrow) %v2021_v12, 24  ;;  %1985 = vst.msk [vmem:[#allocation3 + $0xe8] sm:$0xff] %vm654_vm3, %v1983_v23  ;;  %v1982_v42 = vadd.f32 %v1980_v29, %v1545_v25  ;;  %v1560_v34 = vadd.f32 %v2534_v48, %v3361_v28 }
 0x24b   : > { %v1554_v49 = vpop.f32.mrf.mxu1  ;;  %v2038_v33 = vld [vmem:[#allocation3 + $0xc0] sm:$0xff] }
 0x24c   : > { %1984 = vst.msk [vmem:[#allocation3 + $0xe0] sm:$0xff] %vm654_vm3, %v1982_v42  ;;  %v2011_v36 = vadd.f32 %v2009_v37, %v1560_v34  ;;  %v1555_v43 = vadd.f32 %v3361_v28, %v1554_v49  ;;  %v2026_v28 = vld [vmem:[#allocation3 + $0x60] sm:$0xff] }
 0x24d   : > { %2081 = vxpose.xlu1.b32.cont [4/16] (narrow) %v2033_v61, 24  ;;  %v2041_v22 = vld [vmem:[#allocation3 + $0xd8] sm:$0xff] }
 0x24e   : > { %2054 = vxpose.xlu0.b32.cont [9/16] (narrow) %v2022_v51, 24  ;;  %2013 = vst.msk [vmem:[#allocation3 + $0xf8] sm:$0xff] %vm654_vm3, %v2011_v36  ;;  %v2010_v38 = vadd.f32 %v2008_v47, %v1555_v43 }
 0x24f   : > { %v2040_v10 = vld [vmem:[#allocation3 + $0xd0] sm:$0xff] }
 0x250   : > { %2012 = vst.msk [vmem:[#allocation3 + $0xf0] sm:$0xff] %vm654_vm3, %v2010_v38 }
 0x251   : > { %2082 = vxpose.xlu1.b32.cont [5/16] (narrow) %v2034_v32, 24  ;;  %v2043_v50 = vld [vmem:[#allocation3 + $0xe8] sm:$0xff] }
 0x252   : > { %2055 = vxpose.xlu0.b32.cont [10/16] (narrow) %v2023_v53, 24 }
 0x253   : > { %v2042_v21 = vld [vmem:[#allocation3 + $0xe0] sm:$0xff] }
 0x255   : > { %2083 = vxpose.xlu1.b32.cont [6/16] (narrow) %v2035_v57, 24  ;;  %v2045_v59 = vld [vmem:[#allocation3 + $0xf8] sm:$0xff] }
 0x256   : > { %2056 = vxpose.xlu0.b32.cont [11/16] (narrow) %v2024_v2, 24 }
 0x257   : > { %v2044_v60 = vld [vmem:[#allocation3 + $0xf0] sm:$0xff] }
 0x259   : > { %2084 = vxpose.xlu1.b32.cont [7/16] (narrow) %v2036_v63, 24 }
 0x25a   : > { %2057 = vxpose.xlu0.b32.cont [12/16] (narrow) %v2025_v3, 24 }
 0x25d   : > { %2085 = vxpose.xlu1.b32.cont [8/16] (narrow) %v2037_v7, 24 }
 0x25e   : > { %2058 = vxpose.xlu0.b32.cont [13/16] (narrow) %v2026_v28, 24 }
 0x261   : > { %2086 = vxpose.xlu1.b32.cont [9/16] (narrow) %v2038_v33, 24 }
 0x262   : > { %2059 = vxpose.xlu0.b32.cont [14/16] (narrow) %v2027_v8, 24 }
 0x265   : > { %2087 = vxpose.xlu1.b32.cont [10/16] (narrow) %v2039_v30, 24 }
 0x266   : > { %2060 = vxpose.xlu0.b32.cont [15/16] (narrow) %v2028_v18, 24 }
 0x269   : > { %2088 = vxpose.xlu1.b32.cont [11/16] (narrow) %v2040_v10, 24 }
 0x26a   : > { %2061 = vxpose.xlu0.b32.end [16/16] (narrow) %v2029_v9, 24 }
 0x26d   : > { %2089 = vxpose.xlu1.b32.cont [12/16] (narrow) %v2041_v22, 24 }
 0x271   : > { %2090 = vxpose.xlu1.b32.cont [13/16] (narrow) %v2042_v21, 24 }
 0x275   : > { %2091 = vxpose.xlu1.b32.cont [14/16] (narrow) %v2043_v50, 24 }
 0x279   : > { %2092 = vxpose.xlu1.b32.cont [15/16] (narrow) %v2044_v60, 24 }
 0x27d   : > { %2093 = vxpose.xlu1.b32.end [16/16] (narrow) %v2045_v59, 24 }
 0x2aa   : > { %v2062_v39 = vpop.trf.xlu0 }
 0x2ab   : > { %2110 = vst [vmem:[%s366_s13] sm:$0xff] %v2062_v39 }
 0x2ae   : > { %v2063_v4 = vpop.trf.xlu0 }
 0x2af   : > { %2112 = vst [vmem:[%s366_s13 + $0x10] sm:$0xff] %v2063_v4 }
 0x2b2   : > { %v2064_v20 = vpop.trf.xlu0 }
 0x2b3   : > { %2114 = vst [vmem:[%s366_s13 + $0x20] sm:$0xff] %v2064_v20 }
 0x2bd   : > { %v2094_v62 = vpop.trf.xlu1 }
 0x2be   : > { %2111 = vst [vmem:[%s366_s13 + $0x8] sm:$0xff] %v2094_v62 }
 0x2c1   : > { %v2095_v46 = vpop.trf.xlu1 }
 0x2c2   : > { %2113 = vst [vmem:[%s366_s13 + $0x18] sm:$0xff] %v2095_v46 }
 0x2c5   : > { %v2096_v5 = vpop.trf.xlu1 }
 0x2c6   : > { %2115 = vst [vmem:[%s366_s13 + $0x28] sm:$0xff] %v2096_v5 }
 0x2c7   : > { %2711 = shalt.err (!%p2708_p1)
}
 0x2c8   : > { %s2712_s14 = scalar_lea.hbm %s3747_s17, 768  ;;  %s2716_s11 = scalar_lea.hbm %s3898_s7, 1536 }
 0x2c9   : > { %p2713_p2 = scmp.ne.s32.totalorder %s3747_s17, %s2712_s14  ;;  %p2717_p6 = scmp.lt.s32.totalorder %s3747_s17, %s3898_s7 }
 0x2ca   : > { %p2718_p7 = scmp.lt.s32.totalorder %s2716_s11, %s2712_s14 }
 0x2cb   : > { %p2714_p3 = pnand %p2713_p2, %p2886_p0 }
 0x2cc   : > { %p2719_p8 = por %p2718_p7, %p2717_p6 }
 0x2cd   : > { %p2715_p5 = pneg %p2714_p3 }
 0x2cf   : > { %p2720_p9 = pnand %p2719_p8, %p2715_p5 }
 0x2d1   : > { %2723 = shalt.err (!%p2720_p9)
}
 0x2d2   : > { %s2783_s9 = smov 256   ;;  %s2784_s25 = smov 16  }
 0x2d3   : > { %2613 = dma.vmem_to_hbm [thread:$0]  (%p2886_p0), %s3742_s18, 768, %s3747_s17, %s3749_s28, %s2783_s9, %s2783_s9, %s2784_s25  }
 0x2d4 PF: > { %s3899_s3 = sld [smem:[#allocation16_spill]] }
 0x2d5   : > { %s3900_s1 = sld [smem:[#allocation11_spill]] }
 0x2da   : > { %p2619_p10 = scmp.ge.s32.totalorder %s3899_s3, 2 }
 0x2db   : > { %s2147_s26 = sand.u32 1, %s3900_s1  }
 0x2dc   : > { %p2616_p11 = pnand %p2619_p10, %p2893_p4  ;;  %s2148_s24 = scalar_lea.sflag [#allocation8], %s2147_s26 }
 0x2de   : > { %p2617_p12 = pneg %p2616_p11 }
 0x2e0   : > { %2751 = dma.done.wait (%p2617_p12), %s2148_s24, 768  }
 0x2e1   : > { %2753 = vsyncadd (%p2617_p12), %s2148_s24, 4294966528  ;;  %s33_s26 = sadd.s32 1, %s3899_s3   ;;  %s3902_s1 = sld [smem:[#allocation12_spill]] }
 0x2e2   : > { %p30_p13 = scmp.ge.s32.totalorder %s33_s26, 4   ;;  %s3903_s22 = sld [smem:[#allocation13_spill]] }
 0x2e3   : > { %s3904_s23 = sld [smem:[#allocation20_spill]] }
 0x2e4   : > { %s3905_s24 = sld [smem:[#allocation15_spill]]  ;;  %32 = sbr.rel (!%p30_p13) target bundleno = 32 (0x20), region = 129 }
 0x2e5   : > { %s3906_s25 = sld [smem:[#allocation17_spill]] }
 0x2e9   :  { %2153 = vsyncpa [#allocation8], 1 }
 0x2ea   :  { %2155 = vsyncpa [#allocation8 + $0x1], 1 }

</bundles_post_ra>
